<compile_context>
chip_gen: v5e
topology: v5e:2x2
jax: 0.10.0
libtpu: 0.0.40
codegen_flags: <defaults>
</compile_context>

<pallas_src>
import functools

import jax
import jax.numpy as jnp
from jax import lax
from jax.experimental import pallas as pl
from jax.experimental.pallas import tpu as pltpu


# ----------------------------- Pallas kernel ------------------------------ #
def _fused_kernel(*refs, relu, fuse_head):
    """acc += P @ W1 over the K grid axis; at the last K step apply +shift,
    optional ReLU, and an optional fused head matmul (+bias), then store."""
    if fuse_head:
        p_ref, w1_ref, shift_ref, w2_ref, b2_ref, o_ref, acc_ref = refs
    else:
        p_ref, w1_ref, shift_ref, o_ref, acc_ref = refs

    k = pl.program_id(1)

    @pl.when(k == 0)
    def _():
        acc_ref[...] = jnp.zeros_like(acc_ref)

    acc_ref[...] += jnp.dot(p_ref[...], w1_ref[...],
                            preferred_element_type=jnp.float32)

    @pl.when(k == pl.num_programs(1) - 1)
    def _():
        y = acc_ref[...] + shift_ref[...]
        if relu:
            y = jnp.maximum(y, 0.0)
        if fuse_head:
            y = jnp.dot(y.astype(w2_ref.dtype), w2_ref[...],
                        preferred_element_type=jnp.float32) + b2_ref[...]
        o_ref[...] = y.astype(o_ref.dtype)


def _pick_row_tile(M, cap=512):
    """Largest tile that divides M; prefer >=2 row tiles so v7x's 2 TCs both work."""
    target = min(cap, M)
    if M >= 256:
        target = min(cap, max(128, M // 2))
    if M <= target:
        return M, False                       # full dim -> always a legal block
    t = target - (target % 8)
    while t >= 8:
        if M % t == 0:
            return t, False
        t -= 8
    return max(8, target - (target % 8)), True  # rare fallback: pad rows


def _pick_k_tile(K, cap=2048):
    if K <= cap:
        return K
    t = cap - (cap % 128)
    while t >= 128:
        if K % t == 0:
            return t
        t -= 128
    # TODO(synk): pad K for huge non-factorable K; full-K block is still correct.
    return K


def fused_matmul(p, w1, shift, *, relu, w2=None, b2=None,
                 out_dtype=jnp.float32, tm_cap=512, tk_cap=2048):
    """out = act((p @ w1) + shift) [ @ w2 + b2 ]   (row / K tiled Pallas matmul).

    p:  (M, K)      bf16 patch / activation matrix (rows = pixels)
    w1: (K, N1)     bf16 weight, BN scale pre-folded into columns
    shift: (1, N1)  f32 per-column shift (BN beta - mean*scale, or bias)
    w2: (N1, N2)    optional bf16 fused-head weight, b2: (1, N2) f32 bias
    """
    M, K = p.shape
    K2, N1 = w1.shape
    assert K == K2
    fuse_head = w2 is not None
    Nout = w2.shape[1] if fuse_head else N1

    tm, needs_pad = _pick_row_tile(M, tm_cap)
    tk = _pick_k_tile(K, tk_cap)
    Mp = M
    if needs_pad:
        Mp = ((M + tm - 1) // tm) * tm
        p = jnp.pad(p, ((0, Mp - M), (0, 0)))

    grid = (Mp // tm, K // tk)

    in_specs = [
        pl.BlockSpec((tm, tk), lambda i, k: (i, k)),
        pl.BlockSpec((tk, N1), lambda i, k: (k, 0)),
        pl.BlockSpec((1, N1), lambda i, k: (0, 0)),
    ]
    args = [p, w1, shift]
    if fuse_head:
        in_specs += [pl.BlockSpec((N1, Nout), lambda i, k: (0, 0)),
                     pl.BlockSpec((1, Nout), lambda i, k: (0, 0))]
        args += [w2, b2]

    out_bytes = jnp.dtype(out_dtype).itemsize
    est = (2 * (tm * tk + tk * N1) * 2            # double-buffered bf16 inputs
           + 2 * tm * Nout * out_bytes            # double-buffered output tile
           + tm * N1 * 4                          # f32 accumulator scratch
           + (N1 * Nout + 2 * (N1 + Nout)) * 4)   # head weight / shift constants
    vmem_limit = int(min(max(2 * est, 32 * 1024 * 1024), 64 * 1024 * 1024))

    out = pl.pallas_call(
        functools.partial(_fused_kernel, relu=relu, fuse_head=fuse_head),
        out_shape=jax.ShapeDtypeStruct((Mp, Nout), out_dtype),
        grid=grid,
        in_specs=in_specs,
        out_specs=pl.BlockSpec((tm, Nout), lambda i, k: (i, 0)),
        scratch_shapes=[pltpu.VMEM((tm, N1), jnp.float32)],
        compiler_params=pltpu.CompilerParams(
            dimension_semantics=("parallel", "arbitrary"),
            vmem_limit_bytes=vmem_limit),
    )(*args)
    return out[:M] if needs_pad else out


# ------------------------ JAX glue (sub-pixel layout) ---------------------- #
# phase py/px -> {3x3 window offset (0..2) : ConvTranspose2d kernel index (0..3)}
_KH_OF = {0: {0: 3, 1: 1}, 1: {1: 2, 2: 0}}


def _deconv_phase_weight(Wt):
    """ConvTranspose2d(4,2,1) weight (C_in, C_out, 4, 4) -> combined sub-pixel
    weight (9*C_in, 4*C_out): rows = (wy, wx, c_in), cols = (py, px, c_out)."""
    C_in, C_out = Wt.shape[0], Wt.shape[1]
    Wc = jnp.zeros((3, 3, C_in, 2, 2, C_out), Wt.dtype)
    for py in (0, 1):
        for wy, kh in _KH_OF[py].items():
            for px in (0, 1):
                for wx, kw in _KH_OF[px].items():
                    Wc = Wc.at[wy, wx, :, py, px, :].set(Wt[:, :, kh, kw])
    return Wc.reshape(9 * C_in, 4 * C_out)


def _phase_patches(x):
    """NHWC x -> stride-1 3x3 patches; rows=(n, y, x), cols=(wy, wx, c)."""
    N, H, W, C = x.shape
    xp = jnp.pad(x, ((0, 0), (1, 1), (1, 1), (0, 0)))
    cols = [xp[:, wy:wy + H, wx:wx + W, :] for wy in range(3) for wx in range(3)]
    return jnp.concatenate(cols, axis=-1).reshape(N * H * W, 9 * C)


def _pixel_shuffle(y, N, H, W, C):
    """(N*H*W, 4*C) phase-major columns -> NHWC (N, 2H, 2W, C)."""
    y = y.reshape(N, H, W, 2, 2, C).transpose(0, 1, 3, 2, 4, 5)
    return y.reshape(N, 2 * H, 2 * W, C)


def keypoint_decoder_forward(x, params, eps=1e-5):
    """x: (N, C_in, H, W) NCHW f32 -> (N, c_out, H*2^L, W*2^L) NCHW f32."""
    Wf, bf = params["final"]
    c_out, c_mid = Wf.shape[0], Wf.shape[1]
    Wm = Wf.reshape(c_out, c_mid).T                      # 1x1 conv == per-pixel matmul

    x = jnp.transpose(x, (0, 2, 3, 1)).astype(jnp.bfloat16)   # NHWC bf16 activations
    n_layers = len(params["deconv"])

    if n_layers == 0:                                    # degenerate: 1x1 conv only
        N, H, W, C = x.shape
        y = fused_matmul(x.reshape(N * H * W, C), Wm.astype(jnp.bfloat16),
                         bf.reshape(1, -1).astype(jnp.float32),
                         relu=False, out_dtype=jnp.float32)
        return y.reshape(N, H, W, c_out).transpose(0, 3, 1, 2)

    for li, (Wt, gamma, beta, r_mean, r_var) in enumerate(params["deconv"]):
        is_last = li == n_layers - 1
        N, H, W, C = x.shape
        Cm = Wt.shape[1]

        scale = gamma / jnp.sqrt(r_var + eps)            # eval-mode BN fold
        shift = beta - r_mean * scale
        W1 = (_deconv_phase_weight(Wt)
              * jnp.tile(scale, 4)[None, :]).astype(jnp.bfloat16)
        shift4 = jnp.tile(shift, 4).reshape(1, -1).astype(jnp.float32)

        P = _phase_patches(x)                            # (N*H*W, 9*C) bf16

        if is_last:
            # fuse the final 1x1 conv head (block-diagonal -> applied per phase)
            W2 = jnp.zeros((4 * Cm, 4 * c_out), jnp.float32)
            for ph in range(4):
                W2 = W2.at[ph * Cm:(ph + 1) * Cm, ph * c_out:(ph + 1) * c_out].set(Wm)
            b2 = jnp.tile(bf, 4).reshape(1, -1).astype(jnp.float32)
            y = fused_matmul(P, W1, shift4, relu=True,
                             w2=W2.astype(jnp.bfloat16), b2=b2,
                             out_dtype=jnp.float32)
            y = _pixel_shuffle(y, N, H, W, c_out)        # (N, 2H, 2W, c_out) f32
            return jnp.transpose(y, (0, 3, 1, 2))        # NCHW
        else:
            y = fused_matmul(P, W1, shift4, relu=True, out_dtype=jnp.bfloat16)
            x = _pixel_shuffle(y, N, H, W, Cm)           # stay NHWC bf16


# --------------------------- reference (pure JAX) -------------------------- #
def reference_forward(x, params, eps=1e-5):
    for (Wt, gamma, beta, r_mean, r_var) in params["deconv"]:
        Wf = jnp.flip(Wt, axis=(2, 3)).transpose(1, 0, 2, 3)   # OIHW
        y = lax.conv_general_dilated(
            x, Wf, window_strides=(1, 1), padding=[(2, 2), (2, 2)],
            lhs_dilation=(2, 2), dimension_numbers=("NCHW", "OIHW", "NCHW"))
        y = (y - r_mean[None, :, None, None]) / jnp.sqrt(r_var[None, :, None, None] + eps)
        y = y * gamma[None, :, None, None] + beta[None, :, None, None]
        x = jnp.maximum(y, 0.0)
    Wf, bf = params["final"]
    y = lax.conv_general_dilated(
        x, Wf, window_strides=(1, 1), padding="VALID",
        dimension_numbers=("NCHW", "OIHW", "NCHW"))
    return y + bf[None, :, None, None]


# ------------------------------ params init -------------------------------- #
def init_params(key, c_in, c_out, num_layers):
    params = {"deconv": [], "final": None}
    ci, co = c_in, c_in // 2
    for _ in range(num_layers):
        key, k1, k2, k3, k4, k5 = jax.random.split(key, 6)
        Wt = 0.1 * jax.random.normal(k1, (ci, co, 4, 4), jnp.float32)   # ConvTranspose2d weight
        gamma = 1.0 + 0.1 * jax.random.normal(k2, (co,), jnp.float32)   # BN weight
        beta = 0.1 * jax.random.normal(k3, (co,), jnp.float32)          # BN bias
        r_mean = 0.1 * jax.random.normal(k4, (co,), jnp.float32)        # BN running_mean
        r_var = 1.0 + 0.1 * jax.random.uniform(k5, (co,), jnp.float32)  # BN running_var
        params["deconv"].append((Wt, gamma, beta, r_mean, r_var))
        ci = co
    key, k1, k2 = jax.random.split(key, 3)
    Wf = 0.1 * jax.random.normal(k1, (c_out, co, 1, 1), jnp.float32)    # final 1x1 conv weight
    bf = 0.1 * jax.random.normal(k2, (c_out,), jnp.float32)             # final conv bias
    params["final"] = (Wf, bf)
    return params


if __name__ == "__main__":
    key = jax.random.PRNGKey(0)
    key, kx, kp = jax.random.split(key, 3)
    c_in, c_out, num_layers = 8, 4, 2
    x = jax.random.normal(kx, (2, c_in, 8, 8), jnp.float32)
    params = init_params(kp, c_in, c_out, num_layers)

    fwd = jax.jit(keypoint_decoder_forward)
    out = jax.block_until_ready(fwd(x, params))
    assert out.shape == (2, c_out, 32, 32), out.shape

    ref = reference_forward(x, params)
    err = float(jnp.max(jnp.abs(out - ref)))
    ref_max = float(jnp.max(jnp.abs(ref)))
    tol = 2e-2 * (1.0 + ref_max)          # bf16 matmul inputs -> loosened tolerance
    if err > tol:
        raise AssertionError(
            f"Pallas result mismatch vs reference, max abs err = {err} (tol {tol})")
    print("KERNEL_OK")
</pallas_src>

<mosaic_0001>
module attributes {stable_mosaic.version = 11 : i64} {
  func.func @_fused_kernel(%arg0: i32, %arg1: i32, %arg2: memref<128x72xbf16, #tpu.memory_space<vmem>>, %arg3: memref<72x16xbf16, #tpu.memory_space<vmem>>, %arg4: memref<1x16xf32, #tpu.memory_space<vmem>>, %arg5: memref<128x16xbf16, #tpu.memory_space<vmem>>, %arg6: memref<128x16xf32, #tpu.memory_space<vmem>>) attributes {dimension_semantics = [#tpu.dimension_semantics<parallel>, #tpu.dimension_semantics<arbitrary>], iteration_bounds = array<i64: 1, 1>, scalar_prefetch = 0 : i64, scratch_operands = 1 : i64, tpu.core_type = #tpu.core_type<tc>, window_params = [{transform_indices = @transform_0, window_bounds = array<i64: 128, 72>}, {transform_indices = @transform_1, window_bounds = array<i64: 72, 16>}, {pipeline_mode = #tpu.pipeline_mode<synchronous>, transform_indices = @transform_2, window_bounds = array<i64: 1, 16>}, {transform_indices = @transform_3, window_bounds = array<i64: 128, 16>}]} {
    %c0_i32 = arith.constant 0 : i32
    %0 = arith.cmpi eq, %arg1, %c0_i32 : i32
    %1 = arith.extui %0 : i1 to i32
    %c0_i32_0 = arith.constant 0 : i32
    %2 = arith.cmpi ne, %1, %c0_i32_0 : i32
    scf.if %2 {
      %cst_10 = arith.constant 0.000000e+00 : f32
      %12 = vector.broadcast %cst_10 : f32 to vector<128x16xf32>
      %c0_11 = arith.constant 0 : index
      %c0_12 = arith.constant 0 : index
      %13 = vector.load %arg6[%c0_11, %c0_12] : memref<128x16xf32, #tpu.memory_space<vmem>>, vector<128x16xf32>
      tpu.vector_store %arg6[%c0_11, %c0_12], %12 {strides = array<i32>} : memref<128x16xf32, #tpu.memory_space<vmem>>, vector<128x16xf32>,
    } else {
    }
    %c0 = arith.constant 0 : index
    %c0_1 = arith.constant 0 : index
    %3 = vector.load %arg6[%c0, %c0_1] : memref<128x16xf32, #tpu.memory_space<vmem>>, vector<128x16xf32>
    %c0_2 = arith.constant 0 : index
    %c0_3 = arith.constant 0 : index
    %4 = vector.load %arg2[%c0_2, %c0_3] : memref<128x72xbf16, #tpu.memory_space<vmem>>, vector<128x72xbf16>
    %c0_4 = arith.constant 0 : index
    %c0_5 = arith.constant 0 : index
    %5 = vector.load %arg3[%c0_4, %c0_5] : memref<72x16xbf16, #tpu.memory_space<vmem>>, vector<72x16xbf16>
    %cst = arith.constant dense<0.000000e+00> : vector<128x16xf32>
    %6 = tpu.matmul %4, %5, %cst {dimension_numbers = #tpu.dot_dimension_numbers<[1], [0], [0], [1], [0, 0, 1, 1], [], []>} : vector<128x72xbf16>, vector<72x16xbf16>, vector<128x16xf32> -> vector<128x16xf32>
    %7 = arith.addf %3, %6 : vector<128x16xf32>
    %c0_6 = arith.constant 0 : index
    %c0_7 = arith.constant 0 : index
    %8 = vector.load %arg6[%c0_6, %c0_7] : memref<128x16xf32, #tpu.memory_space<vmem>>, vector<128x16xf32>
    tpu.vector_store %arg6[%c0_6, %c0_7], %7 {strides = array<i32>} : memref<128x16xf32, #tpu.memory_space<vmem>>, vector<128x16xf32>,
    %c0_i32_8 = arith.constant 0 : i32
    %9 = arith.cmpi eq, %arg1, %c0_i32_8 : i32
    %10 = arith.extui %9 : i1 to i32
    %c0_i32_9 = arith.constant 0 : i32
    %11 = arith.cmpi ne, %10, %c0_i32_9 : i32
    scf.if %11 {
      %c0_10 = arith.constant 0 : index
      %c0_11 = arith.constant 0 : index
      %12 = vector.load %arg6[%c0_10, %c0_11] : memref<128x16xf32, #tpu.memory_space<vmem>>, vector<128x16xf32>
      %c0_12 = arith.constant 0 : index
      %c0_13 = arith.constant 0 : index
      %13 = vector.load %arg4[%c0_12, %c0_13] : memref<1x16xf32, #tpu.memory_space<vmem>>, vector<1x16xf32>
      %14 = vector.broadcast %13 : vector<1x16xf32> to vector<128x16xf32>
      %15 = arith.addf %12, %14 : vector<128x16xf32>
      %cst_14 = arith.constant 0.000000e+00 : f32
      %16 = vector.broadcast %cst_14 : f32 to vector<128x16xf32>
      %17 = arith.maximumf %15, %16 : vector<128x16xf32>
      %18 = arith.truncf %17 : vector<128x16xf32> to vector<128x16xbf16>
      %c0_15 = arith.constant 0 : index
      %c0_16 = arith.constant 0 : index
      %19 = vector.load %arg5[%c0_15, %c0_16] : memref<128x16xbf16, #tpu.memory_space<vmem>>, vector<128x16xbf16>
      tpu.vector_store %arg5[%c0_15, %c0_16], %18 {strides = array<i32>} : memref<128x16xbf16, #tpu.memory_space<vmem>>, vector<128x16xbf16>,
    } else {
    }
    return
  }
  func.func @transform_0(%arg0: i32, %arg1: i32) -> (i32, i32) {
    %c0_i32 = arith.constant 0 : i32
    return %arg0, %arg1 : i32, i32
  }
  func.func @transform_1(%arg0: i32, %arg1: i32) -> (i32, i32) {
    %c0_i32 = arith.constant 0 : i32
    %c0_i32_0 = arith.constant 0 : i32
    return %arg1, %c0_i32 : i32, i32
  }
  func.func @transform_2(%arg0: i32, %arg1: i32) -> (i32, i32) {
    %c0_i32 = arith.constant 0 : i32
    %c0_i32_0 = arith.constant 0 : i32
    %c0_i32_1 = arith.constant 0 : i32
    return %c0_i32, %c0_i32_0 : i32, i32
  }
  func.func @transform_3(%arg0: i32, %arg1: i32) -> (i32, i32) {
    %c0_i32 = arith.constant 0 : i32
    %c0_i32_0 = arith.constant 0 : i32
    return %arg0, %c0_i32 : i32, i32
  }
}

module attributes {stable_mosaic.version = 11 : i64} {
  func.func @_fused_kernel(%arg0: i32, %arg1: i32, %arg2: memref<256x36xbf16, #tpu.memory_space<vmem>>, %arg3: memref<36x16xbf16, #tpu.memory_space<vmem>>, %arg4: memref<1x16xf32, #tpu.memory_space<vmem>>, %arg5: memref<16x16xbf16, #tpu.memory_space<vmem>>, %arg6: memref<1x16xf32, #tpu.memory_space<vmem>>, %arg7: memref<256x16xf32, #tpu.memory_space<vmem>>, %arg8: memref<256x16xf32, #tpu.memory_space<vmem>>) attributes {dimension_semantics = [#tpu.dimension_semantics<parallel>, #tpu.dimension_semantics<arbitrary>], iteration_bounds = array<i64: 2, 1>, scalar_prefetch = 0 : i64, scratch_operands = 1 : i64, tpu.core_type = #tpu.core_type<tc>, window_params = [{transform_indices = @transform_0, window_bounds = array<i64: 256, 36>}, {transform_indices = @transform_1, window_bounds = array<i64: 36, 16>}, {pipeline_mode = #tpu.pipeline_mode<synchronous>, transform_indices = @transform_2, window_bounds = array<i64: 1, 16>}, {pipeline_mode = #tpu.pipeline_mode<synchronous>, transform_indices = @transform_3, window_bounds = array<i64: 16, 16>}, {pipeline_mode = #tpu.pipeline_mode<synchronous>, transform_indices = @transform_4, window_bounds = array<i64: 1, 16>}, {transform_indices = @transform_5, window_bounds = array<i64: 256, 16>}]} {
    %c0_i32 = arith.constant 0 : i32
    %0 = arith.cmpi eq, %arg1, %c0_i32 : i32
    %1 = arith.extui %0 : i1 to i32
    %c0_i32_0 = arith.constant 0 : i32
    %2 = arith.cmpi ne, %1, %c0_i32_0 : i32
    scf.if %2 {
      %cst_10 = arith.constant 0.000000e+00 : f32
      %12 = vector.broadcast %cst_10 : f32 to vector<256x16xf32>
      %c0_11 = arith.constant 0 : index
      %c0_12 = arith.constant 0 : index
      %13 = vector.load %arg8[%c0_11, %c0_12] : memref<256x16xf32, #tpu.memory_space<vmem>>, vector<256x16xf32>
      tpu.vector_store %arg8[%c0_11, %c0_12], %12 {strides = array<i32>} : memref<256x16xf32, #tpu.memory_space<vmem>>, vector<256x16xf32>,
    } else {
    }
    %c0 = arith.constant 0 : index
    %c0_1 = arith.constant 0 : index
    %3 = vector.load %arg8[%c0, %c0_1] : memref<256x16xf32, #tpu.memory_space<vmem>>, vector<256x16xf32>
    %c0_2 = arith.constant 0 : index
    %c0_3 = arith.constant 0 : index
    %4 = vector.load %arg2[%c0_2, %c0_3] : memref<256x36xbf16, #tpu.memory_space<vmem>>, vector<256x36xbf16>
    %c0_4 = arith.constant 0 : index
    %c0_5 = arith.constant 0 : index
    %5 = vector.load %arg3[%c0_4, %c0_5] : memref<36x16xbf16, #tpu.memory_space<vmem>>, vector<36x16xbf16>
    %cst = arith.constant dense<0.000000e+00> : vector<256x16xf32>
    %6 = tpu.matmul %4, %5, %cst {dimension_numbers = #tpu.dot_dimension_numbers<[1], [0], [0], [1], [0, 0, 1, 1], [], []>} : vector<256x36xbf16>, vector<36x16xbf16>, vector<256x16xf32> -> vector<256x16xf32>
    %7 = arith.addf %3, %6 : vector<256x16xf32>
    %c0_6 = arith.constant 0 : index
    %c0_7 = arith.constant 0 : index
    %8 = vector.load %arg8[%c0_6, %c0_7] : memref<256x16xf32, #tpu.memory_space<vmem>>, vector<256x16xf32>
    tpu.vector_store %arg8[%c0_6, %c0_7], %7 {strides = array<i32>} : memref<256x16xf32, #tpu.memory_space<vmem>>, vector<256x16xf32>,
    %c0_i32_8 = arith.constant 0 : i32
    %9 = arith.cmpi eq, %arg1, %c0_i32_8 : i32
    %10 = arith.extui %9 : i1 to i32
    %c0_i32_9 = arith.constant 0 : i32
    %11 = arith.cmpi ne, %10, %c0_i32_9 : i32
    scf.if %11 {
      %c0_10 = arith.constant 0 : index
      %c0_11 = arith.constant 0 : index
      %12 = vector.load %arg8[%c0_10, %c0_11] : memref<256x16xf32, #tpu.memory_space<vmem>>, vector<256x16xf32>
      %c0_12 = arith.constant 0 : index
      %c0_13 = arith.constant 0 : index
      %13 = vector.load %arg4[%c0_12, %c0_13] : memref<1x16xf32, #tpu.memory_space<vmem>>, vector<1x16xf32>
      %14 = vector.broadcast %13 : vector<1x16xf32> to vector<256x16xf32>
      %15 = arith.addf %12, %14 : vector<256x16xf32>
      %cst_14 = arith.constant 0.000000e+00 : f32
      %16 = vector.broadcast %cst_14 : f32 to vector<256x16xf32>
      %17 = arith.maximumf %15, %16 : vector<256x16xf32>
      %18 = arith.truncf %17 : vector<256x16xf32> to vector<256x16xbf16>
      %c0_15 = arith.constant 0 : index
      %c0_16 = arith.constant 0 : index
      %19 = vector.load %arg5[%c0_15, %c0_16] : memref<16x16xbf16, #tpu.memory_space<vmem>>, vector<16x16xbf16>
      %cst_17 = arith.constant dense<0.000000e+00> : vector<256x16xf32>
      %20 = tpu.matmul %18, %19, %cst_17 {dimension_numbers = #tpu.dot_dimension_numbers<[1], [0], [0], [1], [0, 0, 1, 1], [], []>} : vector<256x16xbf16>, vector<16x16xbf16>, vector<256x16xf32> -> vector<256x16xf32>
      %c0_18 = arith.constant 0 : index
      %c0_19 = arith.constant 0 : index
      %21 = vector.load %arg6[%c0_18, %c0_19] : memref<1x16xf32, #tpu.memory_space<vmem>>, vector<1x16xf32>
      %22 = vector.broadcast %21 : vector<1x16xf32> to vector<256x16xf32>
      %23 = arith.addf %20, %22 : vector<256x16xf32>
      %c0_20 = arith.constant 0 : index
      %c0_21 = arith.constant 0 : index
      %24 = vector.load %arg7[%c0_20, %c0_21] : memref<256x16xf32, #tpu.memory_space<vmem>>, vector<256x16xf32>
      tpu.vector_store %arg7[%c0_20, %c0_21], %23 {strides = array<i32>} : memref<256x16xf32, #tpu.memory_space<vmem>>, vector<256x16xf32>,
    } else {
    }
    return
  }
  func.func @transform_0(%arg0: i32, %arg1: i32) -> (i32, i32) {
    %c0_i32 = arith.constant 0 : i32
    return %arg0, %arg1 : i32, i32
  }
  func.func @transform_1(%arg0: i32, %arg1: i32) -> (i32, i32) {
    %c0_i32 = arith.constant 0 : i32
    %c0_i32_0 = arith.constant 0 : i32
    return %arg1, %c0_i32 : i32, i32
  }
  func.func @transform_2(%arg0: i32, %arg1: i32) -> (i32, i32) {
    %c0_i32 = arith.constant 0 : i32
    %c0_i32_0 = arith.constant 0 : i32
    %c0_i32_1 = arith.constant 0 : i32
    return %c0_i32, %c0_i32_0 : i32, i32
  }
  func.func @transform_3(%arg0: i32, %arg1: i32) -> (i32, i32) {
    %c0_i32 = arith.constant 0 : i32
    %c0_i32_0 = arith.constant 0 : i32
    %c0_i32_1 = arith.constant 0 : i32
    return %c0_i32, %c0_i32_0 : i32, i32
  }
  func.func @transform_4(%arg0: i32, %arg1: i32) -> (i32, i32) {
    %c0_i32 = arith.constant 0 : i32
    %c0_i32_0 = arith.constant 0 : i32
    %c0_i32_1 = arith.constant 0 : i32
    return %c0_i32, %c0_i32_0 : i32, i32
  }
  func.func @transform_5(%arg0: i32, %arg1: i32) -> (i32, i32) {
    %c0_i32 = arith.constant 0 : i32
    %c0_i32_0 = arith.constant 0 : i32
    return %arg0, %c0_i32 : i32, i32
  }
}

</mosaic_0001>

<bundles_post_ra>
// kernel: tile.28
= control target key start
LH: loop header
LB: loop body
LE: loop exit
PB: predicated region body
PF: predicated region fallthrough
CT: control target
= control target key end

     0   :  { %s22_s0 = inlined_call_operand.vmem [shape: f32[4], index: 0, kind: input, shape index: {}]   ;;  %s23_s1 = inlined_call_operand.vmem [shape: f32[4,4], index: 1, kind: output, shape index: {}]  }
   0x1   :  { %v4_v0 = vld [vmem:[%s22_s0] ss:$0 sm:$0xff] }
   0x2   :  { %5 = vst [vmem:[%s23_s1] sm:$0xf] %v4_v0 }

// kernel: mul.12
= control target key start
LH: loop header
LB: loop body
LE: loop exit
PB: predicated region body
PF: predicated region fallthrough
CT: control target
= control target key end

     0   :  { %s37_s8 = smov 4   ;;  %s38_s9 = smov 8   ;;  %vm7_vm0 = vcmask 31744   ;;  %vm13_vm1 = vcmask 130144   ;;  %vm19_vm2 = vcmask 97344   ;;  %vm25_vm3 = vcmask 64544   ;;  %s55_s0 = inlined_call_operand.vmem [shape: f32[4,4], index: 0, kind: input, shape index: {}]   ;;  %s56_s1 = inlined_call_operand.vmem [shape: f32[16], index: 1, kind: output, shape index: {}]  }
   0x1   :  { %v4_v0 = vld [vmem:[%s55_s0] sm:$0xf]  ;;  %s36_s0 = smov 12  }
   0x2   :  { %5 = vst [vmem:[#allocation1] sm:$0xf] %v4_v0 }
   0x9   :  { %v10_v1 = vld [vmem:[#allocation1 + $0x3] sm:$0x1]   ;;  %v22_v2 = vld [vmem:[#allocation1 + $0x1] sm:$0x1]   ;;  %v16_v3 = vld [vmem:[#allocation1 + $0x2] sm:$0x1]  }
   0xa   :  { %11 = vrot.lane.b32.xlu0 %v10_v1, %s36_s0  ;;  %23 = vrot.lane.b32.xlu1 %v22_v2, %s37_s8  ;;  %v6_v4 = vld [vmem:[#allocation1] sm:$0x1]  }
   0xb   :  { %8 = vst.msk [vmem:[#allocation0] sm:$0x1] %vm7_vm0, %v6_v4  }
  0x12   :  { %17 = vrot.lane.b32.xlu0 %v16_v3, %s38_s9 }
  0x7c   :  { %v12_v5 = vpop.permute.xlu0 %11   ;;  %v24_v6 = vpop.permute.xlu1 %23  }
  0x7d   :  { %14 = vst.msk [vmem:[#allocation0] sm:$0x1] %vm13_vm1, %v12_v5  }
  0x84   :  { %v18_v7 = vpop.permute.xlu0 %17  }
  0x85   :  { %20 = vst.msk [vmem:[#allocation0] sm:$0x1] %vm19_vm2, %v18_v7  }
  0x86   :  { %26 = vst.msk [vmem:[#allocation0] sm:$0x1] %vm25_vm3, %v24_v6  }
  0x8d   :  { %v29_v8 = vld [vmem:[#allocation0] sm:$0x1] }
  0x8e   :  { %32 = vst [vmem:[%s56_s1] sm:$0x1] %v29_v8 }

// kernel: tile.34
= control target key start
LH: loop header
LB: loop body
LE: loop exit
PB: predicated region body
PF: predicated region fallthrough
CT: control target
= control target key end

     0   :  { %s37_s8 = smov 4   ;;  %s38_s9 = smov 8   ;;  %vm7_vm0 = vcmask 31744   ;;  %vm13_vm1 = vcmask 130144   ;;  %vm19_vm2 = vcmask 97344   ;;  %vm25_vm3 = vcmask 64544   ;;  %s55_s0 = inlined_call_operand.vmem [shape: f32[4,4], index: 0, kind: input, shape index: {}]   ;;  %s56_s1 = inlined_call_operand.vmem [shape: f32[1,16], index: 1, kind: output, shape index: {}]  }
   0x1   :  { %v4_v0 = vld [vmem:[%s55_s0] sm:$0xf]  ;;  %s36_s0 = smov 12  }
   0x2   :  { %5 = vst [vmem:[#allocation1] sm:$0xf] %v4_v0 }
   0x9   :  { %v10_v1 = vld [vmem:[#allocation1 + $0x3] sm:$0x1]   ;;  %v22_v2 = vld [vmem:[#allocation1 + $0x1] sm:$0x1]   ;;  %v16_v3 = vld [vmem:[#allocation1 + $0x2] sm:$0x1]  }
   0xa   :  { %11 = vrot.lane.b32.xlu0 %v10_v1, %s36_s0  ;;  %23 = vrot.lane.b32.xlu1 %v22_v2, %s37_s8  ;;  %v6_v4 = vld [vmem:[#allocation1] sm:$0x1]  }
   0xb   :  { %8 = vst.msk [vmem:[#allocation0] sm:$0x1] %vm7_vm0, %v6_v4  }
  0x12   :  { %17 = vrot.lane.b32.xlu0 %v16_v3, %s38_s9 }
  0x7c   :  { %v12_v5 = vpop.permute.xlu0 %11   ;;  %v24_v6 = vpop.permute.xlu1 %23  }
  0x7d   :  { %14 = vst.msk [vmem:[#allocation0] sm:$0x1] %vm13_vm1, %v12_v5  }
  0x84   :  { %v18_v7 = vpop.permute.xlu0 %17  }
  0x85   :  { %20 = vst.msk [vmem:[#allocation0] sm:$0x1] %vm19_vm2, %v18_v7  }
  0x86   :  { %26 = vst.msk [vmem:[#allocation0] sm:$0x1] %vm25_vm3, %v24_v6  }
  0x8d   :  { %v29_v8 = vld [vmem:[#allocation0] sm:$0x1] }
  0x8e   :  { %32 = vst [vmem:[%s56_s1] sm:$0x1] %v29_v8 }

// kernel: keypoint_decoder_forward.2
= control target key start
LH: loop header
LB: loop body
LE: loop exit
PB: predicated region body
PF: predicated region fallthrough
CT: control target
= control target key end

     0   :  { %vm169_vm0 = vcmask 1043456   ;;  %vm19_vm1 = vcmask 130048   ;;  %v432_v6 = vmov 0.0   ;;  %vm144_vm2 = vcmask 588800   ;;  %s617_s1 = inlined_call_operand.vmem [shape: bf16[72,16], index: 1, kind: input, shape index: {}]   ;;  %s618_s2 = inlined_call_operand.vmem [shape: f32[1,16], index: 2, kind: input, shape index: {}]   ;;  %s619_s0 = inlined_call_operand.vmem [shape: bf16[128,72], index: 0, kind: input, shape index: {}]   ;;  %s620_s3 = inlined_call_operand.vmem [shape: bf16[128,16], index: 3, kind: output, shape index: {}]  }
   0x1   :  { %v76_v0 = vld [vmem:[%s617_s1 + $0x20] sm:$0xf]  ;;  %v414_v4 = vld [vmem:[%s617_s1 + $0x18] sm:$0xff]  ;;  %v413_v5 = vld [vmem:[%s617_s1 + $0x10] sm:$0xff]  ;;  %20 = vst.msk [vmem:[#allocation2] sm:$0xff] %vm19_vm1, %v432_v6  ;;  %vm326_vm3 = vcmask 125952  }
   0x2   :  { %v134_v1 = vunpack.c.l.b16 %v76_v0  ;;  %21 = vst.msk [vmem:[#allocation2 + $0x8] sm:$0xff] %vm19_vm1, %v432_v6  ;;  %v412_v7 = vld [vmem:[%s617_s1 + $0x8] sm:$0xff]  ;;  %v411_v8 = vld [vmem:[%s617_s1] sm:$0xff]  ;;  %v405_v10 = vld [vmem:[%s619_s0 + $0x10] sm:$0xff] }
   0x3   :  { %22 = vst.msk [vmem:[#allocation2 + $0x10] sm:$0xff] %vm19_vm1, %v432_v6  ;;  %v403_v9 = vld [vmem:[%s619_s0] sm:$0xff]  ;;  %v409_v12 = vld [vmem:[%s619_s0 + $0x30] sm:$0xff]  ;;  %v404_v13 = vld [vmem:[%s619_s0 + $0x8] sm:$0xff] }
   0x4   :  { %v139_v2 = vpack.c.b16 %v134_v1, %v134_v1  ;;  %23 = vst.msk [vmem:[#allocation2 + $0x18] sm:$0xff] %vm19_vm1, %v432_v6  ;;  %v407_v11 = vld [vmem:[%s619_s0 + $0x20] sm:$0xff]  ;;  %v406_v14 = vld [vmem:[%s619_s0 + $0x18] sm:$0xff]  ;;  %v408_v15 = vld [vmem:[%s619_s0 + $0x28] sm:$0xff] }
   0x5   :  { %24 = vst.msk [vmem:[#allocation2 + $0x20] sm:$0xff] %vm19_vm1, %v432_v6  ;;  %v410_v16 = vld [vmem:[%s619_s0 + $0x38] sm:$0xff]  ;;  %v521_v27 = vld [vmem:[%s618_s2] ss:$0 sm:$0xff] }
   0x6   :  { %v171_v3 = vsel %vm169_vm0, %v139_v2, 0  ;;  %25 = vst.msk [vmem:[#allocation2 + $0x28] sm:$0xff] %vm19_vm1, %v432_v6 }
   0x7   :  { %176 = vmatpush.bf16.msra.mxu0 %v171_v3  ;;  %415 = vmatpush.bf16.msra.mxu1 %v171_v3  ;;  %26 = vst.msk [vmem:[#allocation2 + $0x30] sm:$0xff] %vm19_vm1, %v432_v6 }
   0x8   :  { %416 = vmatpush.bf16.msra.mxu2 %v171_v3  ;;  %417 = vmatpush.bf16.msra.mxu3 %v171_v3  ;;  %27 = vst.msk [vmem:[#allocation2 + $0x38] sm:$0xff] %vm19_vm1, %v432_v6  ;;  %v36_v17 = vld [vmem:[#allocation2] sm:$0xff] }
   0x9   :  { %28 = vst.msk [vmem:[#allocation2 + $0x40] sm:$0xff] %vm19_vm1, %v432_v6  ;;  %v37_v25 = vld [vmem:[#allocation2 + $0x8] sm:$0xff] }
   0xa   :  { %29 = vst.msk [vmem:[#allocation2 + $0x48] sm:$0xff] %vm19_vm1, %v432_v6  ;;  %v38_v44 = vld [vmem:[#allocation2 + $0x10] sm:$0xff] }
   0xb   :  { %177 = vmatpush.bf16.msra.mxu0 %v414_v4  ;;  %418 = vmatpush.bf16.msra.mxu1 %v414_v4  ;;  %30 = vst.msk [vmem:[#allocation2 + $0x50] sm:$0xff] %vm19_vm1, %v432_v6 }
   0xc   :  { %419 = vmatpush.bf16.msra.mxu2 %v414_v4  ;;  %420 = vmatpush.bf16.msra.mxu3 %v414_v4  ;;  %31 = vst.msk [vmem:[#allocation2 + $0x58] sm:$0xff] %vm19_vm1, %v432_v6  ;;  %v40_v18 = vld [vmem:[#allocation2 + $0x20] sm:$0xff] }
   0xd   :  { %32 = vst.msk [vmem:[#allocation2 + $0x60] sm:$0xff] %vm19_vm1, %v432_v6  ;;  %v41_v26 = vld [vmem:[#allocation2 + $0x28] sm:$0xff] }
   0xe   :  { %33 = vst.msk [vmem:[#allocation2 + $0x68] sm:$0xff] %vm19_vm1, %v432_v6  ;;  %v42_v48 = vld [vmem:[#allocation2 + $0x30] sm:$0xff] }
   0xf   :  { %178 = vmatpush.bf16.msra.mxu0 %v413_v5  ;;  %421 = vmatpush.bf16.msra.mxu1 %v413_v5  ;;  %34 = vst.msk [vmem:[#allocation2 + $0x70] sm:$0xff] %vm19_vm1, %v432_v6 }
  0x10   :  { %422 = vmatpush.bf16.msra.mxu2 %v413_v5  ;;  %423 = vmatpush.bf16.msra.mxu3 %v413_v5  ;;  %35 = vst.msk [vmem:[#allocation2 + $0x78] sm:$0xff] %vm19_vm1, %v432_v6  ;;  %v44_v23 = vld [vmem:[#allocation2 + $0x40] sm:$0xff] }
  0x11   :  { %v45_v41 = vld [vmem:[#allocation2 + $0x48] sm:$0xff] }
  0x12   :  { %v46_v2 = vld [vmem:[#allocation2 + $0x50] sm:$0xff] }
  0x13   :  { %179 = vmatpush.bf16.msra.mxu0 %v412_v7  ;;  %424 = vmatpush.bf16.msra.mxu1 %v412_v7 }
  0x14   :  { %425 = vmatpush.bf16.msra.mxu2 %v412_v7  ;;  %426 = vmatpush.bf16.msra.mxu3 %v412_v7  ;;  %v48_v24 = vld [vmem:[#allocation2 + $0x60] sm:$0xff] }
  0x15   :  { %v49_v42 = vld [vmem:[#allocation2 + $0x68] sm:$0xff] }
  0x16   :  { %v50_v5 = vld [vmem:[#allocation2 + $0x70] sm:$0xff] }
  0x17   :  { %180 = vmatpush.bf16.msra.mxu0 %v411_v8  ;;  %427 = vmatpush.bf16.msra.mxu1 %v411_v8 }
  0x18   :  { %428 = vmatpush.bf16.msra.mxu2 %v411_v8  ;;  %429 = vmatpush.bf16.msra.mxu3 %v411_v8 }
  0x1a   :  { %395 = vmatmul.msk.bf16.vlgmr.msra.gmra.mxu0 %vm144_vm2, %v403_v9  ;;  %397 = vmatmul.msk.bf16.vlgmr.msra.gmra.mxu1 %vm144_vm2, %v405_v10  ;;  %v39_v10 = vld [vmem:[#allocation2 + $0x18] sm:$0xff] }
  0x1b   :  { %399 = vmatmul.msk.bf16.vlgmr.msra.gmra.mxu2 %vm144_vm2, %v407_v11  ;;  %401 = vmatmul.msk.bf16.vlgmr.msra.gmra.mxu3 %vm144_vm2, %v409_v12 }
  0x2a   :  { %396 = vmatmul.msk.bf16.gmra.mxu0 %vm144_vm2, %v404_v13  ;;  %398 = vmatmul.msk.bf16.gmra.mxu1 %vm144_vm2, %v406_v14  ;;  %v43_v14 = vld [vmem:[#allocation2 + $0x38] sm:$0xff] }
  0x2b   :  { %400 = vmatmul.msk.bf16.gmra.mxu2 %vm144_vm2, %v408_v15  ;;  %402 = vmatmul.msk.bf16.gmra.mxu3 %vm144_vm2, %v410_v16 }
  0x97   :  { %v182_v19 = vpop.f32.mrf.mxu0  ;;  %v192_v20 = vpop.f32.mrf.mxu1 }
  0x98   :  { %v222_v21 = vadd.f32 %v182_v19, %v36_v17  ;;  %v226_v22 = vadd.f32 %v192_v20, %v40_v18 }
  0x9a   :  { %239 = vst.msk [vmem:[#allocation2] sm:$0xff] %vm19_vm1, %v222_v21 }
  0x9b   :  { %243 = vst.msk [vmem:[#allocation2 + $0x20] sm:$0xff] %vm19_vm1, %v226_v22 }
  0x9e   :  { %v202_v28 = vpop.f32.mrf.mxu2  ;;  %v212_v29 = vpop.f32.mrf.mxu3 }
  0x9f   :  { %v230_v30 = vadd.f32 %v202_v28, %v44_v23  ;;  %v234_v31 = vadd.f32 %v212_v29, %v48_v24  ;;  %v184_v32 = vpop.f32.mrf.mxu0  ;;  %v194_v33 = vpop.f32.mrf.mxu1 }
  0xa0   :  { %v223_v34 = vadd.f32 %v184_v32, %v37_v25  ;;  %v227_v35 = vadd.f32 %v194_v33, %v41_v26 }
  0xa1   :  { %v258_v36 = vld [vmem:[#allocation2] sm:$0xff]  ;;  %247 = vst.msk [vmem:[#allocation2 + $0x40] sm:$0xff] %vm19_vm1, %v230_v30 }
  0xa2   :  { %v278_v37 = vadd.f32 %v521_v27, %v258_v36  ;;  %v262_v38 = vld [vmem:[#allocation2 + $0x20] sm:$0xff]  ;;  %251 = vst.msk [vmem:[#allocation2 + $0x60] sm:$0xff] %vm19_vm1, %v234_v31  ;;  %v47_v31 = vld [vmem:[#allocation2 + $0x58] sm:$0xff] }
  0xa3   :  { %v282_v39 = vadd.f32 %v521_v27, %v262_v38  ;;  %240 = vst.msk [vmem:[#allocation2 + $0x8] sm:$0xff] %vm19_vm1, %v223_v34 }
  0xa4   :  { %v294_v40 = vmax.f32 %v278_v37, 0.0  ;;  %244 = vst.msk [vmem:[#allocation2 + $0x28] sm:$0xff] %vm19_vm1, %v227_v35  ;;  %v51_v35 = vld [vmem:[#allocation2 + $0x78] sm:$0xff] }
  0xa5   :  { %v298_v43 = vmax.f32 %v282_v39, 0.0 }
  0xa6   :  { %v310_v45 = vpack.c.bf16 %v294_v40, %v294_v40  ;;  %v204_v46 = vpop.f32.mrf.mxu2  ;;  %v214_v47 = vpop.f32.mrf.mxu3 }
  0xa7   :  { %v314_v49 = vpack.c.bf16 %v298_v43, %v298_v43  ;;  %v231_v50 = vadd.f32 %v204_v46, %v45_v41  ;;  %v235_v51 = vadd.f32 %v214_v47, %v49_v42  ;;  %v187_v52 = vpop.f32.mrf.mxu0  ;;  %v197_v53 = vpop.f32.mrf.mxu1 }
  0xa8   :  { %327 = vst.msk [vmem:[%s620_s3] sm:$0xf] %vm326_vm3, %v310_v45  ;;  %v266_v54 = vld [vmem:[#allocation2 + $0x40] sm:$0xff]  ;;  %v224_v55 = vadd.f32 %v187_v52, %v38_v44  ;;  %v228_v58 = vadd.f32 %v197_v53, %v42_v48 }
  0xa9   :  { %331 = vst.msk [vmem:[%s620_s3 + $0x10] sm:$0xf] %vm326_vm3, %v314_v49  ;;  %v286_v56 = vadd.f32 %v521_v27, %v266_v54  ;;  %v270_v57 = vld [vmem:[#allocation2 + $0x60] sm:$0xff] }
  0xaa   :  { %v290_v59 = vadd.f32 %v521_v27, %v270_v57  ;;  %v259_v60 = vld [vmem:[#allocation2 + $0x8] sm:$0xff]  ;;  %248 = vst.msk [vmem:[#allocation2 + $0x48] sm:$0xff] %vm19_vm1, %v231_v50 }
  0xab   :  { %v302_v61 = vmax.f32 %v286_v56, 0.0  ;;  %v279_v62 = vadd.f32 %v521_v27, %v259_v60  ;;  %v263_v63 = vld [vmem:[#allocation2 + $0x28] sm:$0xff]  ;;  %252 = vst.msk [vmem:[#allocation2 + $0x68] sm:$0xff] %vm19_vm1, %v235_v51 }
  0xac   :  { %v306_v0 = vmax.f32 %v290_v59, 0.0  ;;  %v283_v1 = vadd.f32 %v521_v27, %v263_v63  ;;  %241 = vst.msk [vmem:[#allocation2 + $0x10] sm:$0xff] %vm19_vm1, %v224_v55 }
  0xad   :  { %v318_v3 = vpack.c.bf16 %v302_v61, %v302_v61  ;;  %v295_v4 = vmax.f32 %v279_v62, 0.0  ;;  %245 = vst.msk [vmem:[#allocation2 + $0x30] sm:$0xff] %vm19_vm1, %v228_v58 }
  0xae   :  { %v322_v6 = vpack.c.bf16 %v306_v0, %v306_v0  ;;  %v299_v7 = vmax.f32 %v283_v1, 0.0  ;;  %v207_v8 = vpop.f32.mrf.mxu2  ;;  %v217_v9 = vpop.f32.mrf.mxu3 }
  0xaf   :  { %335 = vst.msk [vmem:[%s620_s3 + $0x20] sm:$0xf] %vm326_vm3, %v318_v3  ;;  %v311_v11 = vpack.c.bf16 %v295_v4, %v295_v4  ;;  %v232_v12 = vadd.f32 %v207_v8, %v46_v2  ;;  %v189_v13 = vpop.f32.mrf.mxu0  ;;  %v199_v15 = vpop.f32.mrf.mxu1  ;;  %v236_v17 = vadd.f32 %v217_v9, %v50_v5 }
  0xb0   :  { %339 = vst.msk [vmem:[%s620_s3 + $0x30] sm:$0xf] %vm326_vm3, %v322_v6  ;;  %v315_v16 = vpack.c.bf16 %v299_v7, %v299_v7  ;;  %v225_v19 = vadd.f32 %v189_v13, %v39_v10  ;;  %v229_v22 = vadd.f32 %v199_v15, %v43_v14 }
  0xb1   :  { %328 = vst.msk [vmem:[%s620_s3 + $0x4] sm:$0xf] %vm326_vm3, %v311_v11  ;;  %v267_v18 = vld [vmem:[#allocation2 + $0x48] sm:$0xff] }
  0xb2   :  { %332 = vst.msk [vmem:[%s620_s3 + $0x14] sm:$0xf] %vm326_vm3, %v315_v16  ;;  %v287_v20 = vadd.f32 %v521_v27, %v267_v18  ;;  %v271_v21 = vld [vmem:[#allocation2 + $0x68] sm:$0xff] }
  0xb3   :  { %v291_v23 = vadd.f32 %v521_v27, %v271_v21  ;;  %v260_v24 = vld [vmem:[#allocation2 + $0x10] sm:$0xff]  ;;  %249 = vst.msk [vmem:[#allocation2 + $0x50] sm:$0xff] %vm19_vm1, %v232_v12 }
  0xb4   :  { %v303_v25 = vmax.f32 %v287_v20, 0.0  ;;  %v280_v26 = vadd.f32 %v521_v27, %v260_v24  ;;  %v264_v28 = vld [vmem:[#allocation2 + $0x30] sm:$0xff]  ;;  %253 = vst.msk [vmem:[#allocation2 + $0x70] sm:$0xff] %vm19_vm1, %v236_v17 }
  0xb5   :  { %v307_v29 = vmax.f32 %v291_v23, 0.0  ;;  %v284_v30 = vadd.f32 %v521_v27, %v264_v28  ;;  %242 = vst.msk [vmem:[#allocation2 + $0x18] sm:$0xff] %vm19_vm1, %v225_v19 }
  0xb6   :  { %v319_v32 = vpack.c.bf16 %v303_v25, %v303_v25  ;;  %v296_v33 = vmax.f32 %v280_v26, 0.0  ;;  %246 = vst.msk [vmem:[#allocation2 + $0x38] sm:$0xff] %vm19_vm1, %v229_v22  ;;  %v209_v34 = vpop.f32.mrf.mxu2  ;;  %v219_v36 = vpop.f32.mrf.mxu3 }
  0xb7   :  { %v323_v37 = vpack.c.bf16 %v307_v29, %v307_v29  ;;  %v300_v38 = vmax.f32 %v284_v30, 0.0  ;;  %v233_v40 = vadd.f32 %v209_v34, %v47_v31  ;;  %v237_v42 = vadd.f32 %v219_v36, %v51_v35 }
  0xb8   :  { %336 = vst.msk [vmem:[%s620_s3 + $0x24] sm:$0xf] %vm326_vm3, %v319_v32  ;;  %v312_v39 = vpack.c.bf16 %v296_v33, %v296_v33 }
  0xb9   :  { %340 = vst.msk [vmem:[%s620_s3 + $0x34] sm:$0xf] %vm326_vm3, %v323_v37  ;;  %v316_v41 = vpack.c.bf16 %v300_v38, %v300_v38 }
  0xba   :  { %329 = vst.msk [vmem:[%s620_s3 + $0x8] sm:$0xf] %vm326_vm3, %v312_v39  ;;  %v268_v43 = vld [vmem:[#allocation2 + $0x50] sm:$0xff] }
  0xbb   :  { %333 = vst.msk [vmem:[%s620_s3 + $0x18] sm:$0xf] %vm326_vm3, %v316_v41  ;;  %v288_v44 = vadd.f32 %v521_v27, %v268_v43  ;;  %v272_v45 = vld [vmem:[#allocation2 + $0x70] sm:$0xff] }
  0xbc   :  { %v292_v46 = vadd.f32 %v521_v27, %v272_v45  ;;  %v261_v47 = vld [vmem:[#allocation2 + $0x18] sm:$0xff]  ;;  %250 = vst.msk [vmem:[#allocation2 + $0x58] sm:$0xff] %vm19_vm1, %v233_v40 }
  0xbd   :  { %v304_v48 = vmax.f32 %v288_v44, 0.0  ;;  %v281_v49 = vadd.f32 %v521_v27, %v261_v47  ;;  %v265_v50 = vld [vmem:[#allocation2 + $0x38] sm:$0xff]  ;;  %254 = vst.msk [vmem:[#allocation2 + $0x78] sm:$0xff] %vm19_vm1, %v237_v42 }
  0xbe   :  { %v308_v51 = vmax.f32 %v292_v46, 0.0  ;;  %v285_v52 = vadd.f32 %v521_v27, %v265_v50 }
  0xbf   :  { %v320_v53 = vpack.c.bf16 %v304_v48, %v304_v48  ;;  %v297_v54 = vmax.f32 %v281_v49, 0.0 }
  0xc0   :  { %v324_v55 = vpack.c.bf16 %v308_v51, %v308_v51  ;;  %v301_v56 = vmax.f32 %v285_v52, 0.0 }
  0xc1   :  { %337 = vst.msk [vmem:[%s620_s3 + $0x28] sm:$0xf] %vm326_vm3, %v320_v53  ;;  %v313_v57 = vpack.c.bf16 %v297_v54, %v297_v54 }
  0xc2   :  { %341 = vst.msk [vmem:[%s620_s3 + $0x38] sm:$0xf] %vm326_vm3, %v324_v55  ;;  %v317_v58 = vpack.c.bf16 %v301_v56, %v301_v56 }
  0xc3   :  { %330 = vst.msk [vmem:[%s620_s3 + $0xc] sm:$0xf] %vm326_vm3, %v313_v57  ;;  %v269_v59 = vld [vmem:[#allocation2 + $0x58] sm:$0xff] }
  0xc4   :  { %334 = vst.msk [vmem:[%s620_s3 + $0x1c] sm:$0xf] %vm326_vm3, %v317_v58  ;;  %v289_v60 = vadd.f32 %v521_v27, %v269_v59  ;;  %v273_v61 = vld [vmem:[#allocation2 + $0x78] sm:$0xff] }
  0xc5   :  { %v293_v62 = vadd.f32 %v521_v27, %v273_v61 }
  0xc6   :  { %v305_v63 = vmax.f32 %v289_v60, 0.0 }
  0xc7   :  { %v309_v0 = vmax.f32 %v293_v62, 0.0 }
  0xc8   :  { %v321_v1 = vpack.c.bf16 %v305_v63, %v305_v63 }
  0xc9   :  { %v325_v2 = vpack.c.bf16 %v309_v0, %v309_v0 }
  0xca   :  { %338 = vst.msk [vmem:[%s620_s3 + $0x2c] sm:$0xf] %vm326_vm3, %v321_v1 }
  0xcb   :  { %342 = vst.msk [vmem:[%s620_s3 + $0x3c] sm:$0xf] %vm326_vm3, %v325_v2 }

// kernel: keypoint_decoder_forward.3
= control target key start
LH: loop header
LB: loop body
LE: loop exit
PB: predicated region body
PF: predicated region fallthrough
CT: control target
= control target key end

     0   :  { %s1290_s18 = smov 0   ;;  %s1292_s19 = smov 0   ;;  %s1593_s0 = inlined_call_operand.vmem [shape: bf16[512,36], index: 0, kind: input, shape index: {}]   ;;  %s1594_s1 = inlined_call_operand.vmem [shape: bf16[36,16], index: 1, kind: input, shape index: {}]   ;;  %s1595_s2 = inlined_call_operand.vmem [shape: f32[1,16], index: 2, kind: input, shape index: {}]   ;;  %s1596_s3 = inlined_call_operand.vmem [shape: bf16[16,16], index: 3, kind: input, shape index: {}]   ;;  %s1597_s4 = inlined_call_operand.vmem [shape: f32[1,16], index: 4, kind: input, shape index: {}]   ;;  %s1598_s5 = inlined_call_operand.vmem [shape: f32[512,16], index: 5, kind: output, shape index: {}]  }
   0x1   :  { %s1294_s20 = smov 0  }
   0x2 LB: > { %s27_s21 = sadd.s32 1, %s1253_s19  ;;  %p1070_p0 = scmp.ge.s32.totalorder %s1257_s20, 1  ;;  %s1257_s20 = sphi %s1294_s20, %s15_s20   ;;  %s1253_s19 = sphi %s1292_s19, %s1600_s19   ;;  %s1249_s18 = sphi %s1290_s18, %s1599_s18  }
   0x3   : > { %p29_p1 = scmp.ge.s32.totalorder %s27_s21, 2  ;;  %p216_p2 = scmp.lt.s32.totalorder %s1257_s20, 3 }
   0x5   : > { %s1602_s21 = smov (%p29_p1, %s27_s21), 0  ;;  %p217_p3 = pnand %p1070_p0, %p216_p2 }
   0x6   : > { %s1071_s24 = sshll.u32 (!%p217_p3), %s1249_s18, 5 }
   0x7   : > { %220 = sbr.rel (%p217_p3) target bundleno = 444 (0x1bc), region = 40  ;;  %p253_p4 = scmp.lt.s32.totalorder (!%p217_p3), %s1071_s24, 63 }
   0xc   : > { %v379_v0 = vld [vmem:[%s1594_s1 + $0x10] sm:$0x3]  ;;  %vm524_vm0 = vcmask 1041408   ;;  %s1604_s24 = smov (!%p253_p4, %s1071_s24), 63  ;;  %v1202_v4 = vld [vmem:[%s1594_s1 + $0x8] sm:$0xff]  ;;  %v1201_v5 = vld [vmem:[%s1594_s1] sm:$0xff] }
   0xd   : > { %v469_v1 = vunpack.c.l.b16 %v379_v0  ;;  %s1072_s27 = sshll.u32 %s1604_s24, 2  ;;  %vm475_vm1 = vcmask 293888   ;;  %vm278_vm2 = vcmask 130048   ;;  %v1259_v18 = vmov 0.0   ;;  %v1203_v23 = vld [vmem:[%s1596_s3] sm:$0xff]  ;;  %s1074_s12 = sshll.u32 %s1604_s24, 3 }
   0xe   : > { %s1323_s7 = scalar_lea.vmem %s1593_s0, %s1072_s27  ;;  %279 = vst.msk [vmem:[#allocation2] sm:$0xff] %vm278_vm2, %v1259_v18  ;;  %868 = vmatpush.bf16.msra.mxu1 %v1203_v23  ;;  %1207 = vmatpush.bf16.msra.mxu3 %v1203_v23  ;;  %v1398_v34 = vld [vmem:[%s1595_s2] ss:$0 sm:$0xff]  ;;  %s1485_s17 = scalar_lea.vmem %s1598_s5, %s1074_s12 }
   0xf   : > { %v472_v2 = vpack.c.b16 %v469_v1, %v469_v1  ;;  %v1185_v6 = vld [vmem:[%s1323_s7] sm:$0xff]  ;;  %v1186_v8 = vld [vmem:[%s1323_s7 + $0x8] sm:$0xff]  ;;  %v1187_v10 = vld [vmem:[%s1323_s7 + $0x10] sm:$0xff]  ;;  %280 = vst.msk [vmem:[#allocation2 + $0x8] sm:$0xff] %vm278_vm2, %v1259_v18 }
  0x10   : > { %v1193_v7 = vld [vmem:[%s1323_s7 + $0x40] sm:$0xff]  ;;  %v1194_v9 = vld [vmem:[%s1323_s7 + $0x48] sm:$0xff]  ;;  %v1195_v11 = vld [vmem:[%s1323_s7 + $0x50] sm:$0xff]  ;;  %281 = vst.msk [vmem:[#allocation2 + $0x10] sm:$0xff] %vm278_vm2, %v1259_v18 }
  0x11   : > { %v526_v3 = vsel %vm524_vm0, %v472_v2, 0  ;;  %v1188_v12 = vld [vmem:[%s1323_s7 + $0x18] sm:$0xff]  ;;  %v1189_v14 = vld [vmem:[%s1323_s7 + $0x20] sm:$0xff]  ;;  %v1190_v16 = vld [vmem:[%s1323_s7 + $0x28] sm:$0xff]  ;;  %282 = vst.msk [vmem:[#allocation2 + $0x18] sm:$0xff] %vm278_vm2, %v1259_v18 }
  0x12   : > { %533 = vmatpush.bf16.msra.mxu0 %v526_v3  ;;  %1204 = vmatpush.bf16.msra.mxu2 %v526_v3  ;;  %v1196_v13 = vld [vmem:[%s1323_s7 + $0x58] sm:$0xff]  ;;  %v1197_v15 = vld [vmem:[%s1323_s7 + $0x60] sm:$0xff]  ;;  %v1198_v17 = vld [vmem:[%s1323_s7 + $0x68] sm:$0xff]  ;;  %283 = vst.msk [vmem:[#allocation2 + $0x20] sm:$0xff] %vm278_vm2, %v1259_v18 }
  0x13   : > { %284 = vst.msk [vmem:[#allocation2 + $0x28] sm:$0xff] %vm278_vm2, %v1259_v18  ;;  %v1191_v19 = vld [vmem:[%s1323_s7 + $0x30] sm:$0xff]  ;;  %v1192_v21 = vld [vmem:[%s1323_s7 + $0x38] sm:$0xff] }
  0x14   : > { %285 = vst.msk [vmem:[#allocation2 + $0x30] sm:$0xff] %vm278_vm2, %v1259_v18  ;;  %v1199_v20 = vld [vmem:[%s1323_s7 + $0x70] sm:$0xff]  ;;  %v1200_v22 = vld [vmem:[%s1323_s7 + $0x78] sm:$0xff] }
  0x15   : > { %286 = vst.msk [vmem:[#allocation2 + $0x38] sm:$0xff] %vm278_vm2, %v1259_v18  ;;  %v311_v24 = vld [vmem:[#allocation2] sm:$0xff] }
  0x16   : > { %534 = vmatpush.bf16.msra.mxu0 %v1202_v4  ;;  %1205 = vmatpush.bf16.msra.mxu2 %v1202_v4  ;;  %287 = vst.msk [vmem:[#allocation2 + $0x40] sm:$0xff] %vm278_vm2, %v1259_v18  ;;  %v312_v29 = vld [vmem:[#allocation2 + $0x8] sm:$0xff] }
  0x17   : > { %288 = vst.msk [vmem:[#allocation2 + $0x48] sm:$0xff] %vm278_vm2, %v1259_v18  ;;  %v313_v36 = vld [vmem:[#allocation2 + $0x10] sm:$0xff] }
  0x18   : > { %289 = vst.msk [vmem:[#allocation2 + $0x50] sm:$0xff] %vm278_vm2, %v1259_v18  ;;  %v314_v48 = vld [vmem:[#allocation2 + $0x18] sm:$0xff] }
  0x19   : > { %290 = vst.msk [vmem:[#allocation2 + $0x58] sm:$0xff] %vm278_vm2, %v1259_v18  ;;  %v315_v55 = vld [vmem:[#allocation2 + $0x20] sm:$0xff] }
  0x1a   : > { %535 = vmatpush.bf16.msra.mxu0 %v1201_v5  ;;  %1206 = vmatpush.bf16.msra.mxu2 %v1201_v5  ;;  %291 = vst.msk [vmem:[#allocation2 + $0x60] sm:$0xff] %vm278_vm2, %v1259_v18  ;;  %v316_v4 = vld [vmem:[#allocation2 + $0x28] sm:$0xff] }
  0x1b   : > { %292 = vst.msk [vmem:[#allocation2 + $0x68] sm:$0xff] %vm278_vm2, %v1259_v18 }
  0x1c   : > { %293 = vst.msk [vmem:[#allocation2 + $0x70] sm:$0xff] %vm278_vm2, %v1259_v18 }
  0x1d   : > { %1147 = vmatmul.msk.bf16.vlgmr.msra.gmra.mxu0 %vm475_vm1, %v1185_v6  ;;  %1155 = vmatmul.msk.bf16.vlgmr.msra.gmra.mxu2 %vm475_vm1, %v1193_v7  ;;  %294 = vst.msk [vmem:[#allocation2 + $0x78] sm:$0xff] %vm278_vm2, %v1259_v18 }
  0x1e   : > { %295 = vst.msk [vmem:[#allocation2 + $0x80] sm:$0xff] %vm278_vm2, %v1259_v18 }
  0x1f   : > { %296 = vst.msk [vmem:[#allocation2 + $0x88] sm:$0xff] %vm278_vm2, %v1259_v18 }
  0x20   : > { %297 = vst.msk [vmem:[#allocation2 + $0x90] sm:$0xff] %vm278_vm2, %v1259_v18 }
  0x21   : > { %298 = vst.msk [vmem:[#allocation2 + $0x98] sm:$0xff] %vm278_vm2, %v1259_v18 }
  0x22   : > { %299 = vst.msk [vmem:[#allocation2 + $0xa0] sm:$0xff] %vm278_vm2, %v1259_v18 }
  0x23   : > { %300 = vst.msk [vmem:[#allocation2 + $0xa8] sm:$0xff] %vm278_vm2, %v1259_v18 }
  0x24   : > { %301 = vst.msk [vmem:[#allocation2 + $0xb0] sm:$0xff] %vm278_vm2, %v1259_v18 }
  0x25   : > { %302 = vst.msk [vmem:[#allocation2 + $0xb8] sm:$0xff] %vm278_vm2, %v1259_v18  ;;  %v327_v27 = vld [vmem:[#allocation2 + $0x80] sm:$0xff] }
  0x26   : > { %303 = vst.msk [vmem:[#allocation2 + $0xc0] sm:$0xff] %vm278_vm2, %v1259_v18  ;;  %v328_v33 = vld [vmem:[#allocation2 + $0x88] sm:$0xff] }
  0x27   : > { %304 = vst.msk [vmem:[#allocation2 + $0xc8] sm:$0xff] %vm278_vm2, %v1259_v18  ;;  %v329_v44 = vld [vmem:[#allocation2 + $0x90] sm:$0xff] }
  0x28   : > { %305 = vst.msk [vmem:[#allocation2 + $0xd0] sm:$0xff] %vm278_vm2, %v1259_v18  ;;  %v330_v53 = vld [vmem:[#allocation2 + $0x98] sm:$0xff] }
  0x29   : > { %306 = vst.msk [vmem:[#allocation2 + $0xd8] sm:$0xff] %vm278_vm2, %v1259_v18  ;;  %v331_v63 = vld [vmem:[#allocation2 + $0xa0] sm:$0xff] }
  0x2a   : > { %307 = vst.msk [vmem:[#allocation2 + $0xe0] sm:$0xff] %vm278_vm2, %v1259_v18 }
  0x2b   : > { %308 = vst.msk [vmem:[#allocation2 + $0xe8] sm:$0xff] %vm278_vm2, %v1259_v18 }
  0x2c   : > { %309 = vst.msk [vmem:[#allocation2 + $0xf0] sm:$0xff] %vm278_vm2, %v1259_v18 }
  0x2d   : > { %1148 = vmatmul.msk.bf16.gmra.mxu0 %vm475_vm1, %v1186_v8  ;;  %1156 = vmatmul.msk.bf16.gmra.mxu2 %vm475_vm1, %v1194_v9  ;;  %310 = vst.msk [vmem:[#allocation2 + $0xf8] sm:$0xff] %vm278_vm2, %v1259_v18 }
  0x3d   : > { %1149 = vmatmul.msk.bf16.gmra.mxu0 %vm475_vm1, %v1187_v10  ;;  %1157 = vmatmul.msk.bf16.gmra.mxu2 %vm475_vm1, %v1195_v11 }
  0x4d   : > { %1150 = vmatmul.msk.bf16.gmra.mxu0 %vm475_vm1, %v1188_v12  ;;  %1158 = vmatmul.msk.bf16.gmra.mxu2 %vm475_vm1, %v1196_v13 }
  0x5d   : > { %1151 = vmatmul.msk.bf16.gmra.mxu0 %vm475_vm1, %v1189_v14  ;;  %1159 = vmatmul.msk.bf16.gmra.mxu2 %vm475_vm1, %v1197_v15  ;;  %v332_v14 = vld [vmem:[#allocation2 + $0xa8] sm:$0xff] }
  0x6d   : > { %1152 = vmatmul.msk.bf16.gmra.mxu0 %vm475_vm1, %v1190_v16  ;;  %1160 = vmatmul.msk.bf16.gmra.mxu2 %vm475_vm1, %v1198_v17  ;;  %v317_v17 = vld [vmem:[#allocation2 + $0x30] sm:$0xff] }
  0x7d   : > { %1153 = vmatmul.msk.bf16.gmra.mxu0 %vm475_vm1, %v1191_v19  ;;  %1161 = vmatmul.msk.bf16.gmra.mxu2 %vm475_vm1, %v1199_v20 }
  0x8d   : > { %1154 = vmatmul.msk.bf16.gmra.mxu0 %vm475_vm1, %v1192_v21  ;;  %1162 = vmatmul.msk.bf16.gmra.mxu2 %vm475_vm1, %v1200_v22 }
  0x9a   : > { %v537_v25 = vpop.f32.mrf.mxu0 }
  0x9b   : > { %v617_v26 = vadd.f32 %v537_v25, %v311_v24  ;;  %v333_v25 = vld [vmem:[#allocation2 + $0xb0] sm:$0xff] }
  0x9d   : > { %650 = vst.msk [vmem:[#allocation2] sm:$0xff] %vm278_vm2, %v617_v26 }
  0xa0   : > { %v577_v28 = vpop.f32.mrf.mxu2 }
  0xa1   : > { %v633_v30 = vadd.f32 %v577_v28, %v327_v27 }
  0xa2   : > { %v539_v31 = vpop.f32.mrf.mxu0 }
  0xa3   : > { %666 = vst.msk [vmem:[#allocation2 + $0x80] sm:$0xff] %vm278_vm2, %v633_v30  ;;  %v618_v32 = vadd.f32 %v539_v31, %v312_v29  ;;  %v318_v30 = vld [vmem:[#allocation2 + $0x38] sm:$0xff] }
  0xa4   : > { %v685_v37 = vld [vmem:[#allocation2] sm:$0xff] }
  0xa5   : > { %651 = vst.msk [vmem:[#allocation2 + $0x8] sm:$0xff] %vm278_vm2, %v618_v32  ;;  %v721_v41 = vadd.f32 %v1398_v34, %v685_v37 }
  0xa7   : > { %v753_v45 = vmax.f32 %v721_v41, 0.0  ;;  %v334_v41 = vld [vmem:[#allocation2 + $0xb8] sm:$0xff] }
  0xa8   : > { %v579_v35 = vpop.f32.mrf.mxu2 }
  0xa9   : > { %v634_v38 = vadd.f32 %v579_v35, %v328_v33 }
  0xaa   : > { %v542_v39 = vpop.f32.mrf.mxu0 }
  0xab   : > { %667 = vst.msk [vmem:[#allocation2 + $0x88] sm:$0xff] %vm278_vm2, %v634_v38  ;;  %v619_v40 = vadd.f32 %v542_v39, %v313_v36 }
  0xac   : > { %v686_v42 = vld [vmem:[#allocation2 + $0x8] sm:$0xff] }
  0xad   : > { %652 = vst.msk [vmem:[#allocation2 + $0x10] sm:$0xff] %vm278_vm2, %v619_v40  ;;  %v722_v43 = vadd.f32 %v1398_v34, %v686_v42 }
  0xaf   : > { %v754_v46 = vmax.f32 %v722_v43, 0.0 }
  0xb0   : > { %v582_v47 = vpop.f32.mrf.mxu2 }
  0xb1   : > { %v635_v49 = vadd.f32 %v582_v47, %v329_v44  ;;  %v785_v50 = vpack.c.bf16 %v754_v46, %v753_v45  ;;  %v319_v44 = vld [vmem:[#allocation2 + $0x40] sm:$0xff] }
  0xb2   : > { %v544_v51 = vpop.f32.mrf.mxu0 }
  0xb3   : > { %668 = vst.msk [vmem:[#allocation2 + $0x90] sm:$0xff] %vm278_vm2, %v635_v49  ;;  %v620_v52 = vadd.f32 %v544_v51, %v314_v48  ;;  %1167 = vmatmul.msk.bf16.vlgmr.msra.gmra.mxu1 %vm278_vm2, %v785_v50 }
  0xb4   : > { %v687_v56 = vld [vmem:[#allocation2 + $0x10] sm:$0xff] }
  0xb5   : > { %653 = vst.msk [vmem:[#allocation2 + $0x18] sm:$0xff] %vm278_vm2, %v620_v52  ;;  %v723_v60 = vadd.f32 %v1398_v34, %v687_v56  ;;  %v335_v52 = vld [vmem:[#allocation2 + $0xc0] sm:$0xff] }
  0xb7   : > { %v755_v1 = vmax.f32 %v723_v60, 0.0 }
  0xb8   : > { %v584_v54 = vpop.f32.mrf.mxu2 }
  0xb9   : > { %v636_v57 = vadd.f32 %v584_v54, %v330_v53 }
  0xba   : > { %v547_v58 = vpop.f32.mrf.mxu0  ;;  %v703_v0 = vld [vmem:[#allocation2 + $0x90] sm:$0xff] }
  0xbb   : > { %669 = vst.msk [vmem:[#allocation2 + $0x98] sm:$0xff] %vm278_vm2, %v636_v57  ;;  %v621_v59 = vadd.f32 %v547_v58, %v315_v55  ;;  %v739_v7 = vadd.f32 %v1398_v34, %v703_v0  ;;  %v320_v57 = vld [vmem:[#allocation2 + $0x48] sm:$0xff] }
  0xbc   : > { %v688_v61 = vld [vmem:[#allocation2 + $0x18] sm:$0xff] }
  0xbd   : > { %654 = vst.msk [vmem:[#allocation2 + $0x20] sm:$0xff] %vm278_vm2, %v621_v59  ;;  %v724_v62 = vadd.f32 %v1398_v34, %v688_v61  ;;  %v771_v12 = vmax.f32 %v739_v7, 0.0 }
  0xbf   : > { %v756_v2 = vmax.f32 %v724_v62, 0.0 }
  0xc0   : > { %v587_v3 = vpop.f32.mrf.mxu2 }
  0xc1   : > { %v637_v5 = vadd.f32 %v587_v3, %v331_v63  ;;  %v786_v6 = vpack.c.bf16 %v756_v2, %v755_v1  ;;  %v336_v3 = vld [vmem:[#allocation2 + $0xc8] sm:$0xff] }
  0xc2   : > { %v549_v8 = vpop.f32.mrf.mxu0  ;;  %v704_v9 = vld [vmem:[#allocation2 + $0x98] sm:$0xff] }
  0xc3   : > { %670 = vst.msk [vmem:[#allocation2 + $0xa0] sm:$0xff] %vm278_vm2, %v637_v5  ;;  %v622_v10 = vadd.f32 %v549_v8, %v316_v4  ;;  %1168 = vmatmul.msk.bf16.gmra.mxu1 %vm278_vm2, %v786_v6  ;;  %v740_v11 = vadd.f32 %v1398_v34, %v704_v9  ;;  %v321_v6 = vld [vmem:[#allocation2 + $0x50] sm:$0xff] }
  0xc4   : > { %v689_v18 = vld [vmem:[#allocation2 + $0x20] sm:$0xff] }
  0xc5   : > { %655 = vst.msk [vmem:[#allocation2 + $0x28] sm:$0xff] %vm278_vm2, %v622_v10  ;;  %v772_v13 = vmax.f32 %v740_v11, 0.0  ;;  %v725_v22 = vadd.f32 %v1398_v34, %v689_v18 }
  0xc7   : > { %v794_v15 = vpack.c.bf16 %v772_v13, %v771_v12  ;;  %v757_v27 = vmax.f32 %v725_v22, 0.0 }
  0xc8   : > { %v589_v16 = vpop.f32.mrf.mxu2 }
  0xc9   : > { %v638_v19 = vadd.f32 %v589_v16, %v332_v14  ;;  %1176 = vmatmul.msk.bf16.vlgmr.msra.gmra.mxu3 %vm278_vm2, %v794_v15  ;;  %v337_v14 = vld [vmem:[#allocation2 + $0xd0] sm:$0xff] }
  0xca   : > { %v552_v20 = vpop.f32.mrf.mxu0  ;;  %v705_v26 = vld [vmem:[#allocation2 + $0xa0] sm:$0xff] }
  0xcb   : > { %671 = vst.msk [vmem:[#allocation2 + $0xa8] sm:$0xff] %vm278_vm2, %v638_v19  ;;  %v623_v21 = vadd.f32 %v552_v20, %v317_v17  ;;  %v741_v33 = vadd.f32 %v1398_v34, %v705_v26  ;;  %v322_v19 = vld [vmem:[#allocation2 + $0x58] sm:$0xff] }
  0xcc   : > { %v690_v23 = vld [vmem:[#allocation2 + $0x28] sm:$0xff] }
  0xcd   : > { %656 = vst.msk [vmem:[#allocation2 + $0x30] sm:$0xff] %vm278_vm2, %v623_v21  ;;  %v726_v24 = vadd.f32 %v1398_v34, %v690_v23  ;;  %v773_v39 = vmax.f32 %v741_v33, 0.0 }
  0xcf   : > { %v758_v28 = vmax.f32 %v726_v24, 0.0 }
  0xd0   : > { %v592_v29 = vpop.f32.mrf.mxu2 }
  0xd1   : > { %v639_v31 = vadd.f32 %v592_v29, %v333_v25  ;;  %v787_v32 = vpack.c.bf16 %v758_v28, %v757_v27  ;;  %v338_v29 = vld [vmem:[#allocation2 + $0xd8] sm:$0xff] }
  0xd2   : > { %v554_v35 = vpop.f32.mrf.mxu0  ;;  %v706_v36 = vld [vmem:[#allocation2 + $0xa8] sm:$0xff] }
  0xd3   : > { %672 = vst.msk [vmem:[#allocation2 + $0xb0] sm:$0xff] %vm278_vm2, %v639_v31  ;;  %v624_v37 = vadd.f32 %v554_v35, %v318_v30  ;;  %1169 = vmatmul.msk.bf16.gmra.mxu1 %vm278_vm2, %v787_v32  ;;  %v742_v38 = vadd.f32 %v1398_v34, %v706_v36  ;;  %v323_v32 = vld [vmem:[#allocation2 + $0x60] sm:$0xff] }
  0xd4   : > { %v691_v45 = vld [vmem:[#allocation2 + $0x30] sm:$0xff] }
  0xd5   : > { %657 = vst.msk [vmem:[#allocation2 + $0x38] sm:$0xff] %vm278_vm2, %v624_v37  ;;  %v774_v40 = vmax.f32 %v742_v38, 0.0  ;;  %v727_v49 = vadd.f32 %v1398_v34, %v691_v45 }
  0xd7   : > { %v795_v42 = vpack.c.bf16 %v774_v40, %v773_v39  ;;  %v759_v54 = vmax.f32 %v727_v49, 0.0 }
  0xd8   : > { %v594_v43 = vpop.f32.mrf.mxu2 }
  0xd9   : > { %v640_v46 = vadd.f32 %v594_v43, %v334_v41  ;;  %1177 = vmatmul.msk.bf16.gmra.mxu3 %vm278_vm2, %v795_v42  ;;  %v339_v41 = vld [vmem:[#allocation2 + $0xe0] sm:$0xff] }
  0xda   : > { %v557_v47 = vpop.f32.mrf.mxu0  ;;  %v707_v53 = vld [vmem:[#allocation2 + $0xb0] sm:$0xff] }
  0xdb   : > { %673 = vst.msk [vmem:[#allocation2 + $0xb8] sm:$0xff] %vm278_vm2, %v640_v46  ;;  %v625_v48 = vadd.f32 %v557_v47, %v319_v44  ;;  %v743_v60 = vadd.f32 %v1398_v34, %v707_v53  ;;  %v324_v46 = vld [vmem:[#allocation2 + $0x68] sm:$0xff] }
  0xdc   : > { %v692_v50 = vld [vmem:[#allocation2 + $0x38] sm:$0xff] }
  0xdd   : > { %658 = vst.msk [vmem:[#allocation2 + $0x40] sm:$0xff] %vm278_vm2, %v625_v48  ;;  %v728_v51 = vadd.f32 %v1398_v34, %v692_v50  ;;  %v775_v1 = vmax.f32 %v743_v60, 0.0 }
  0xdf   : > { %v760_v55 = vmax.f32 %v728_v51, 0.0 }
  0xe0   : > { %v597_v56 = vpop.f32.mrf.mxu2 }
  0xe1   : > { %v641_v58 = vadd.f32 %v597_v56, %v335_v52  ;;  %v788_v59 = vpack.c.bf16 %v760_v55, %v759_v54  ;;  %v340_v56 = vld [vmem:[#allocation2 + $0xe8] sm:$0xff] }
  0xe2   : > { %v559_v61 = vpop.f32.mrf.mxu0  ;;  %v708_v62 = vld [vmem:[#allocation2 + $0xb8] sm:$0xff] }
  0xe3   : > { %674 = vst.msk [vmem:[#allocation2 + $0xc0] sm:$0xff] %vm278_vm2, %v641_v58  ;;  %v626_v63 = vadd.f32 %v559_v61, %v320_v57  ;;  %1170 = vmatmul.msk.bf16.gmra.mxu1 %vm278_vm2, %v788_v59  ;;  %v744_v0 = vadd.f32 %v1398_v34, %v708_v62  ;;  %v325_v59 = vld [vmem:[#allocation2 + $0x70] sm:$0xff] }
  0xe4   : > { %v693_v7 = vld [vmem:[#allocation2 + $0x40] sm:$0xff] }
  0xe5   : > { %659 = vst.msk [vmem:[#allocation2 + $0x48] sm:$0xff] %vm278_vm2, %v626_v63  ;;  %v776_v2 = vmax.f32 %v744_v0, 0.0  ;;  %v729_v11 = vadd.f32 %v1398_v34, %v693_v7 }
  0xe7   : > { %v796_v4 = vpack.c.bf16 %v776_v2, %v775_v1  ;;  %v761_v16 = vmax.f32 %v729_v11, 0.0 }
  0xe8   : > { %v599_v5 = vpop.f32.mrf.mxu2 }
  0xe9   : > { %v642_v8 = vadd.f32 %v599_v5, %v336_v3  ;;  %1178 = vmatmul.msk.bf16.gmra.mxu3 %vm278_vm2, %v796_v4  ;;  %v341_v3 = vld [vmem:[#allocation2 + $0xf0] sm:$0xff] }
  0xea   : > { %v562_v9 = vpop.f32.mrf.mxu0  ;;  %v709_v15 = vld [vmem:[#allocation2 + $0xc0] sm:$0xff] }
  0xeb   : > { %675 = vst.msk [vmem:[#allocation2 + $0xc8] sm:$0xff] %vm278_vm2, %v642_v8  ;;  %v627_v10 = vadd.f32 %v562_v9, %v321_v6  ;;  %v745_v22 = vadd.f32 %v1398_v34, %v709_v15  ;;  %v326_v8 = vld [vmem:[#allocation2 + $0x78] sm:$0xff] }
  0xec   : > { %v694_v12 = vld [vmem:[#allocation2 + $0x48] sm:$0xff] }
  0xed   : > { %660 = vst.msk [vmem:[#allocation2 + $0x50] sm:$0xff] %vm278_vm2, %v627_v10  ;;  %v730_v13 = vadd.f32 %v1398_v34, %v694_v12  ;;  %v777_v27 = vmax.f32 %v745_v22, 0.0 }
  0xef   : > { %v762_v17 = vmax.f32 %v730_v13, 0.0 }
  0xf0   : > { %v602_v18 = vpop.f32.mrf.mxu2 }
  0xf1   : > { %v643_v20 = vadd.f32 %v602_v18, %v337_v14  ;;  %v789_v21 = vpack.c.bf16 %v762_v17, %v761_v16  ;;  %v342_v18 = vld [vmem:[#allocation2 + $0xf8] sm:$0xff] }
  0xf2   : > { %v564_v23 = vpop.f32.mrf.mxu0  ;;  %v710_v24 = vld [vmem:[#allocation2 + $0xc8] sm:$0xff] }
  0xf3   : > { %676 = vst.msk [vmem:[#allocation2 + $0xd0] sm:$0xff] %vm278_vm2, %v643_v20  ;;  %v628_v25 = vadd.f32 %v564_v23, %v322_v19  ;;  %1171 = vmatmul.msk.bf16.gmra.mxu1 %vm278_vm2, %v789_v21  ;;  %v746_v26 = vadd.f32 %v1398_v34, %v710_v24 }
  0xf4   : > { %v695_v33 = vld [vmem:[#allocation2 + $0x50] sm:$0xff] }
  0xf5   : > { %661 = vst.msk [vmem:[#allocation2 + $0x58] sm:$0xff] %vm278_vm2, %v628_v25  ;;  %v778_v28 = vmax.f32 %v746_v26, 0.0  ;;  %v731_v38 = vadd.f32 %v1398_v34, %v695_v33 }
  0xf7   : > { %v797_v30 = vpack.c.bf16 %v778_v28, %v777_v27  ;;  %v763_v43 = vmax.f32 %v731_v38, 0.0  ;;  %v701_v38 = vld [vmem:[#allocation2 + $0x80] sm:$0xff] }
  0xf8   : > { %v604_v31 = vpop.f32.mrf.mxu2 }
  0xf9   : > { %v644_v35 = vadd.f32 %v604_v31, %v338_v29  ;;  %1179 = vmatmul.msk.bf16.gmra.mxu3 %vm278_vm2, %v797_v30 }
  0xfa   : > { %v567_v36 = vpop.f32.mrf.mxu0  ;;  %v711_v42 = vld [vmem:[#allocation2 + $0xd0] sm:$0xff] }
  0xfb   : > { %677 = vst.msk [vmem:[#allocation2 + $0xd8] sm:$0xff] %vm278_vm2, %v644_v35  ;;  %v629_v37 = vadd.f32 %v567_v36, %v323_v32  ;;  %v747_v49 = vadd.f32 %v1398_v34, %v711_v42  ;;  %v702_v36 = vld [vmem:[#allocation2 + $0x88] sm:$0xff] }
  0xfc   : > { %v696_v39 = vld [vmem:[#allocation2 + $0x58] sm:$0xff] }
  0xfd   : > { %662 = vst.msk [vmem:[#allocation2 + $0x60] sm:$0xff] %vm278_vm2, %v629_v37  ;;  %v732_v40 = vadd.f32 %v1398_v34, %v696_v39  ;;  %v779_v54 = vmax.f32 %v747_v49, 0.0  ;;  %v738_v39 = vadd.f32 %v1398_v34, %v702_v36 }
  0xff   : > { %v764_v44 = vmax.f32 %v732_v40, 0.0  ;;  %v737_v40 = vadd.f32 %v1398_v34, %v701_v38  ;;  %v770_v42 = vmax.f32 %v738_v39, 0.0 }
 0x100   : > { %v607_v45 = vpop.f32.mrf.mxu2 }
 0x101   : > { %v645_v47 = vadd.f32 %v607_v45, %v339_v41  ;;  %v790_v48 = vpack.c.bf16 %v764_v44, %v763_v43  ;;  %v1480_v41 = vld [vmem:[%s1597_s4] ss:$0 sm:$0xff]  ;;  %v769_v43 = vmax.f32 %v737_v40, 0.0 }
 0x102   : > { %v569_v50 = vpop.f32.mrf.mxu0  ;;  %v712_v51 = vld [vmem:[#allocation2 + $0xd8] sm:$0xff] }
 0x103   : > { %678 = vst.msk [vmem:[#allocation2 + $0xe0] sm:$0xff] %vm278_vm2, %v645_v47  ;;  %v630_v52 = vadd.f32 %v569_v50, %v324_v46  ;;  %1172 = vmatmul.msk.bf16.gmra.mxu1 %vm278_vm2, %v790_v48  ;;  %v748_v53 = vadd.f32 %v1398_v34, %v712_v51  ;;  %v793_v45 = vpack.c.bf16 %v770_v42, %v769_v43 }
 0x104   : > { %v697_v60 = vld [vmem:[#allocation2 + $0x60] sm:$0xff] }
 0x105   : > { %663 = vst.msk [vmem:[#allocation2 + $0x68] sm:$0xff] %vm278_vm2, %v630_v52  ;;  %v780_v55 = vmax.f32 %v748_v53, 0.0  ;;  %v733_v0 = vadd.f32 %v1398_v34, %v697_v60 }
 0x107   : > { %v798_v57 = vpack.c.bf16 %v780_v55, %v779_v54  ;;  %v765_v5 = vmax.f32 %v733_v0, 0.0 }
 0x108   : > { %v609_v58 = vpop.f32.mrf.mxu2 }
 0x109   : > { %v646_v61 = vadd.f32 %v609_v58, %v340_v56  ;;  %1180 = vmatmul.msk.bf16.gmra.mxu3 %vm278_vm2, %v798_v57 }
 0x10a   : > { %v572_v62 = vpop.f32.mrf.mxu0  ;;  %v713_v4 = vld [vmem:[#allocation2 + $0xe0] sm:$0xff] }
 0x10b   : > { %679 = vst.msk [vmem:[#allocation2 + $0xe8] sm:$0xff] %vm278_vm2, %v646_v61  ;;  %v631_v63 = vadd.f32 %v572_v62, %v325_v59  ;;  %v749_v11 = vadd.f32 %v1398_v34, %v713_v4 }
 0x10c   : > { %v698_v1 = vld [vmem:[#allocation2 + $0x68] sm:$0xff] }
 0x10d   : > { %664 = vst.msk [vmem:[#allocation2 + $0x70] sm:$0xff] %vm278_vm2, %v631_v63  ;;  %v734_v2 = vadd.f32 %v1398_v34, %v698_v1  ;;  %v781_v16 = vmax.f32 %v749_v11, 0.0 }
 0x10f   : > { %v766_v6 = vmax.f32 %v734_v2, 0.0 }
 0x110   : > { %v612_v7 = vpop.f32.mrf.mxu2 }
 0x111   : > { %v647_v9 = vadd.f32 %v612_v7, %v341_v3  ;;  %v791_v10 = vpack.c.bf16 %v766_v6, %v765_v5 }
 0x112   : > { %v574_v12 = vpop.f32.mrf.mxu0  ;;  %v714_v13 = vld [vmem:[#allocation2 + $0xe8] sm:$0xff] }
 0x113   : > { %680 = vst.msk [vmem:[#allocation2 + $0xf0] sm:$0xff] %vm278_vm2, %v647_v9  ;;  %v632_v14 = vadd.f32 %v574_v12, %v326_v8  ;;  %1173 = vmatmul.msk.bf16.gmra.mxu1 %vm278_vm2, %v791_v10  ;;  %v750_v15 = vadd.f32 %v1398_v34, %v714_v13 }
 0x114   : > { %v699_v21 = vld [vmem:[#allocation2 + $0x70] sm:$0xff] }
 0x115   : > { %665 = vst.msk [vmem:[#allocation2 + $0x78] sm:$0xff] %vm278_vm2, %v632_v14  ;;  %v782_v17 = vmax.f32 %v750_v15, 0.0  ;;  %v735_v23 = vadd.f32 %v1398_v34, %v699_v21 }
 0x117   : > { %v799_v19 = vpack.c.bf16 %v782_v17, %v781_v16  ;;  %v767_v27 = vmax.f32 %v735_v23, 0.0 }
 0x118   : > { %v614_v20 = vpop.f32.mrf.mxu2 }
 0x119   : > { %v648_v22 = vadd.f32 %v614_v20, %v342_v18  ;;  %1181 = vmatmul.msk.bf16.gmra.mxu3 %vm278_vm2, %v799_v19 }
 0x11a   : > { %v715_v26 = vld [vmem:[#allocation2 + $0xf0] sm:$0xff] }
 0x11b   : > { %681 = vst.msk [vmem:[#allocation2 + $0xf8] sm:$0xff] %vm278_vm2, %v648_v22  ;;  %v751_v30 = vadd.f32 %v1398_v34, %v715_v26 }
 0x11c   : > { %v700_v24 = vld [vmem:[#allocation2 + $0x78] sm:$0xff] }
 0x11d   : > { %v736_v25 = vadd.f32 %v1398_v34, %v700_v24  ;;  %v783_v33 = vmax.f32 %v751_v30, 0.0 }
 0x11f   : > { %v768_v28 = vmax.f32 %v736_v25, 0.0 }
 0x121   : > { %v792_v29 = vpack.c.bf16 %v768_v28, %v767_v27 }
 0x122   : > { %v716_v31 = vld [vmem:[#allocation2 + $0xf8] sm:$0xff] }
 0x123   : > { %1174 = vmatmul.msk.bf16.gmra.mxu1 %vm278_vm2, %v792_v29  ;;  %v752_v32 = vadd.f32 %v1398_v34, %v716_v31 }
 0x125   : > { %v784_v35 = vmax.f32 %v752_v32, 0.0 }
 0x127   : > { %v800_v37 = vpack.c.bf16 %v784_v35, %v783_v33 }
 0x129   : > { %1182 = vmatmul.msk.bf16.gmra.mxu3 %vm278_vm2, %v800_v37 }
 0x130   : > { %v870_v44 = vpop.f32.mrf.mxu1 }
 0x131   : > { %v871_v34 = vadd.f32 %v1480_v41, %v870_v44 }
 0x133   : > { %950 = vst.msk [vmem:[%s1485_s17] sm:$0xff] %vm278_vm2, %v871_v34  ;;  %1175 = vmatmul.msk.bf16.gmra.mxu1 %vm278_vm2, %v793_v45 }
 0x138   : > { %v872_v46 = vpop.f32.mrf.mxu1 }
 0x139   : > { %v873_v47 = vadd.f32 %v1480_v41, %v872_v46 }
 0x13b   : > { %951 = vst.msk [vmem:[%s1485_s17 + $0x8] sm:$0xff] %vm278_vm2, %v873_v47 }
 0x140   : > { %v875_v48 = vpop.f32.mrf.mxu1 }
 0x141   : > { %v876_v49 = vadd.f32 %v1480_v41, %v875_v48 }
 0x143   : > { %952 = vst.msk [vmem:[%s1485_s17 + $0x10] sm:$0xff] %vm278_vm2, %v876_v49 }
 0x148   : > { %v877_v50 = vpop.f32.mrf.mxu1 }
 0x149   : > { %v878_v51 = vadd.f32 %v1480_v41, %v877_v50 }
 0x14b   : > { %953 = vst.msk [vmem:[%s1485_s17 + $0x18] sm:$0xff] %vm278_vm2, %v878_v51 }
 0x14c   : > { %v915_v52 = vpop.f32.mrf.mxu3 }
 0x14d   : > { %v916_v53 = vadd.f32 %v1480_v41, %v915_v52 }
 0x14f   : > { %968 = vst.msk [vmem:[%s1485_s17 + $0x90] sm:$0xff] %vm278_vm2, %v916_v53 }
 0x150   : > { %v880_v54 = vpop.f32.mrf.mxu1 }
 0x151   : > { %v881_v55 = vadd.f32 %v1480_v41, %v880_v54 }
 0x153   : > { %954 = vst.msk [vmem:[%s1485_s17 + $0x20] sm:$0xff] %vm278_vm2, %v881_v55 }
 0x154   : > { %v917_v56 = vpop.f32.mrf.mxu3 }
 0x155   : > { %v918_v57 = vadd.f32 %v1480_v41, %v917_v56 }
 0x157   : > { %969 = vst.msk [vmem:[%s1485_s17 + $0x98] sm:$0xff] %vm278_vm2, %v918_v57 }
 0x158   : > { %v882_v58 = vpop.f32.mrf.mxu1 }
 0x159   : > { %v883_v59 = vadd.f32 %v1480_v41, %v882_v58 }
 0x15b   : > { %955 = vst.msk [vmem:[%s1485_s17 + $0x28] sm:$0xff] %vm278_vm2, %v883_v59 }
 0x15c   : > { %v920_v60 = vpop.f32.mrf.mxu3 }
 0x15d   : > { %v921_v61 = vadd.f32 %v1480_v41, %v920_v60 }
 0x15f   : > { %970 = vst.msk [vmem:[%s1485_s17 + $0xa0] sm:$0xff] %vm278_vm2, %v921_v61 }
 0x160   : > { %v885_v62 = vpop.f32.mrf.mxu1 }
 0x161   : > { %v886_v63 = vadd.f32 %v1480_v41, %v885_v62 }
 0x163   : > { %956 = vst.msk [vmem:[%s1485_s17 + $0x30] sm:$0xff] %vm278_vm2, %v886_v63 }
 0x164   : > { %v922_v0 = vpop.f32.mrf.mxu3 }
 0x165   : > { %v923_v1 = vadd.f32 %v1480_v41, %v922_v0 }
 0x167   : > { %971 = vst.msk [vmem:[%s1485_s17 + $0xa8] sm:$0xff] %vm278_vm2, %v923_v1 }
 0x168   : > { %v887_v2 = vpop.f32.mrf.mxu1 }
 0x169   : > { %v888_v3 = vadd.f32 %v1480_v41, %v887_v2 }
 0x16b   : > { %957 = vst.msk [vmem:[%s1485_s17 + $0x38] sm:$0xff] %vm278_vm2, %v888_v3 }
 0x16c   : > { %v925_v4 = vpop.f32.mrf.mxu3 }
 0x16d   : > { %v926_v5 = vadd.f32 %v1480_v41, %v925_v4 }
 0x16f   : > { %972 = vst.msk [vmem:[%s1485_s17 + $0xb0] sm:$0xff] %vm278_vm2, %v926_v5 }
 0x170   : > { %v890_v6 = vpop.f32.mrf.mxu1 }
 0x171   : > { %v891_v7 = vadd.f32 %v1480_v41, %v890_v6 }
 0x173   : > { %958 = vst.msk [vmem:[%s1485_s17 + $0x40] sm:$0xff] %vm278_vm2, %v891_v7 }
 0x174   : > { %v927_v8 = vpop.f32.mrf.mxu3 }
 0x175   : > { %v928_v9 = vadd.f32 %v1480_v41, %v927_v8 }
 0x177   : > { %973 = vst.msk [vmem:[%s1485_s17 + $0xb8] sm:$0xff] %vm278_vm2, %v928_v9 }
 0x178   : > { %v892_v10 = vpop.f32.mrf.mxu1 }
 0x179   : > { %v893_v11 = vadd.f32 %v1480_v41, %v892_v10 }
 0x17b   : > { %959 = vst.msk [vmem:[%s1485_s17 + $0x48] sm:$0xff] %vm278_vm2, %v893_v11 }
 0x17c   : > { %v930_v12 = vpop.f32.mrf.mxu3 }
 0x17d   : > { %v931_v13 = vadd.f32 %v1480_v41, %v930_v12 }
 0x17f   : > { %974 = vst.msk [vmem:[%s1485_s17 + $0xc0] sm:$0xff] %vm278_vm2, %v931_v13 }
 0x180   : > { %v895_v14 = vpop.f32.mrf.mxu1 }
 0x181   : > { %v896_v15 = vadd.f32 %v1480_v41, %v895_v14 }
 0x183   : > { %960 = vst.msk [vmem:[%s1485_s17 + $0x50] sm:$0xff] %vm278_vm2, %v896_v15 }
 0x184   : > { %v932_v16 = vpop.f32.mrf.mxu3 }
 0x185   : > { %v933_v17 = vadd.f32 %v1480_v41, %v932_v16 }
 0x187   : > { %975 = vst.msk [vmem:[%s1485_s17 + $0xc8] sm:$0xff] %vm278_vm2, %v933_v17 }
 0x188   : > { %v897_v18 = vpop.f32.mrf.mxu1 }
 0x189   : > { %v898_v19 = vadd.f32 %v1480_v41, %v897_v18 }
 0x18b   : > { %961 = vst.msk [vmem:[%s1485_s17 + $0x58] sm:$0xff] %vm278_vm2, %v898_v19 }
 0x18c   : > { %v935_v20 = vpop.f32.mrf.mxu3 }
 0x18d   : > { %v936_v21 = vadd.f32 %v1480_v41, %v935_v20 }
 0x18f   : > { %976 = vst.msk [vmem:[%s1485_s17 + $0xd0] sm:$0xff] %vm278_vm2, %v936_v21 }
 0x190   : > { %v900_v22 = vpop.f32.mrf.mxu1 }
 0x191   : > { %v901_v23 = vadd.f32 %v1480_v41, %v900_v22 }
 0x193   : > { %962 = vst.msk [vmem:[%s1485_s17 + $0x60] sm:$0xff] %vm278_vm2, %v901_v23 }
 0x194   : > { %v937_v24 = vpop.f32.mrf.mxu3 }
 0x195   : > { %v938_v25 = vadd.f32 %v1480_v41, %v937_v24 }
 0x197   : > { %977 = vst.msk [vmem:[%s1485_s17 + $0xd8] sm:$0xff] %vm278_vm2, %v938_v25 }
 0x198   : > { %v902_v26 = vpop.f32.mrf.mxu1 }
 0x199   : > { %v903_v27 = vadd.f32 %v1480_v41, %v902_v26 }
 0x19b   : > { %963 = vst.msk [vmem:[%s1485_s17 + $0x68] sm:$0xff] %vm278_vm2, %v903_v27 }
 0x19c   : > { %v940_v28 = vpop.f32.mrf.mxu3 }
 0x19d   : > { %v941_v29 = vadd.f32 %v1480_v41, %v940_v28 }
 0x19f   : > { %978 = vst.msk [vmem:[%s1485_s17 + $0xe0] sm:$0xff] %vm278_vm2, %v941_v29 }
 0x1a0   : > { %v905_v30 = vpop.f32.mrf.mxu1 }
 0x1a1   : > { %v906_v31 = vadd.f32 %v1480_v41, %v905_v30 }
 0x1a3   : > { %964 = vst.msk [vmem:[%s1485_s17 + $0x70] sm:$0xff] %vm278_vm2, %v906_v31 }
 0x1a4   : > { %v942_v32 = vpop.f32.mrf.mxu3 }
 0x1a5   : > { %v943_v33 = vadd.f32 %v1480_v41, %v942_v32 }
 0x1a7   : > { %979 = vst.msk [vmem:[%s1485_s17 + $0xe8] sm:$0xff] %vm278_vm2, %v943_v33 }
 0x1a8   : > { %v907_v35 = vpop.f32.mrf.mxu1 }
 0x1a9   : > { %v908_v36 = vadd.f32 %v1480_v41, %v907_v35 }
 0x1ab   : > { %965 = vst.msk [vmem:[%s1485_s17 + $0x78] sm:$0xff] %vm278_vm2, %v908_v36 }
 0x1ac   : > { %v945_v37 = vpop.f32.mrf.mxu3 }
 0x1ad   : > { %v946_v38 = vadd.f32 %v1480_v41, %v945_v37 }
 0x1af   : > { %980 = vst.msk [vmem:[%s1485_s17 + $0xf0] sm:$0xff] %vm278_vm2, %v946_v38 }
 0x1b0   : > { %v910_v39 = vpop.f32.mrf.mxu1 }
 0x1b1   : > { %v911_v40 = vadd.f32 %v1480_v41, %v910_v39 }
 0x1b3   : > { %966 = vst.msk [vmem:[%s1485_s17 + $0x80] sm:$0xff] %vm278_vm2, %v911_v40 }
 0x1b4   : > { %v947_v42 = vpop.f32.mrf.mxu3 }
 0x1b5   : > { %v948_v43 = vadd.f32 %v1480_v41, %v947_v42 }
 0x1b7   : > { %981 = vst.msk [vmem:[%s1485_s17 + $0xf8] sm:$0xff] %vm278_vm2, %v948_v43 }
 0x1b8   : > { %v912_v44 = vpop.f32.mrf.mxu1 }
 0x1b9   : > { %v913_v34 = vadd.f32 %v1480_v41, %v912_v44 }
 0x1bb   : > { %967 = vst.msk [vmem:[%s1485_s17 + $0x88] sm:$0xff] %vm278_vm2, %v913_v34 }
 0x1bc PF: > { %s15_s20 = sadd.s32 1, %s1257_s20   ;;  %s1599_s18 = smov %s1253_s19 }
 0x1bd   : > { %p12_p5 = scmp.ge.s32.totalorder %s15_s20, 4   ;;  %s1600_s19 = smov %s1602_s21 }
 0x1bf   :  { %14 = sbr.rel (!%p12_p5) target bundleno = 2 (0x2), region = 81 }

</bundles_post_ra>
